<compile_context>
chip_gen: v5e
topology: v5e:2x2
jax: 0.10.0
libtpu: 0.0.40
codegen_flags: <defaults>
</compile_context>

<pallas_src>
import math

import jax
import jax.numpy as jnp
from jax import lax
from jax.experimental import pallas as pl
from jax.experimental.pallas import tpu as pltpu

H = 64                  # config.hidden_sizes[0]
N_HEADS = 4
HEAD_DIM = H // N_HEADS  # 16
WPAD = 128              # every weight padded to 128 output lanes
F_IN = 8                # entity-state features padded to 8


def prey_attn_actor_kernel(pred_ref, prey_ref, obst_ref, dead_ref,
                           w1_ref, w_ref, b_ref, out_ref):
    tb, n_pred, _ = pred_ref.shape
    n_prey = prey_ref.shape[1]
    n_obst = obst_ref.shape[1]
    n_tot = n_pred + n_prey + n_obst
    f32, bf16 = jnp.float32, jnp.bfloat16

    # --- entity encoders (batch folded into matmul rows, bf16 MXU, f32 acc) ---
    def enc(x3d, i):
        rows = x3d.shape[0] * x3d.shape[1]
        xin = x3d.reshape(rows, F_IN).astype(bf16)
        h = jnp.dot(xin, w1_ref[i], preferred_element_type=f32) + b_ref[i]
        h = jnp.maximum(h, 0.0).astype(bf16)
        # entity-type embedding already folded into b_ref[3+i]; lanes 64:128 stay 0
        return jnp.dot(h, w_ref[i], preferred_element_type=f32) + b_ref[3 + i]

    x_pred = enc(pred_ref[...], 0).reshape(tb, n_pred, WPAD)
    x_prey = enc(prey_ref[...], 1)                           # (tb*n_prey, 128)
    x_obst = enc(obst_ref[...], 2).reshape(tb, n_obst, WPAD)
    x = jnp.concatenate([x_pred, x_prey.reshape(tb, n_prey, WPAD), x_obst], axis=1)

    # --- Q and fused K|V projections (128-lane results) ----------------------
    q = jnp.dot(x_prey.astype(bf16), w_ref[3], preferred_element_type=f32) + b_ref[6]
    kv = jnp.dot(x.reshape(tb * n_tot, WPAD).astype(bf16), w_ref[4],
                 preferred_element_type=f32) + b_ref[7]
    q_b = q.reshape(tb, n_prey, WPAD).astype(bf16)     # lanes 64:128 are zero
    kv_b = kv.reshape(tb, n_tot, WPAD).astype(bf16)    # lanes 0:64 = K, 64:128 = V

    # --- additive mask: -1e9 iff (query prey dead) AND (key is a dead prey) ---
    dead = dead_ref[...]                               # (tb, n_prey) in {0,1}
    dead_k = jnp.concatenate([jnp.zeros((tb, n_pred), f32), dead,
                              jnp.zeros((tb, n_obst), f32)], axis=1)
    neg_bias = dead[:, :, None] * (dead_k * (-1e9))[:, None, :]   # (tb,n_prey,n_tot)

    # --- 4-head attention, heads merged via lane masks (no slicing) ----------
    lane = lax.broadcasted_iota(jnp.int32, (1, 1, WPAD), 2)
    ctx = jnp.zeros((tb, n_prey, WPAD), f32)
    for hd in range(N_HEADS):
        qm = ((lane >= hd * HEAD_DIM) & (lane < (hd + 1) * HEAD_DIM)).astype(bf16)
        vm = ((lane >= H + hd * HEAD_DIM) & (lane < H + (hd + 1) * HEAD_DIM)).astype(bf16)
        s = jnp.einsum('bqd,bkd->bqk', q_b * qm, kv_b,
                       preferred_element_type=f32) + neg_bias
        m = jnp.max(s, axis=-1, keepdims=True)
        p = jnp.exp(s - m)
        p = p * pl.reciprocal(jnp.sum(p, axis=-1, keepdims=True), approx=True)
        # head hd's context lands in lanes [64+16*hd, 64+16*(hd+1)); other lanes 0
        ctx = ctx + jnp.einsum('bqk,bkd->bqd', p.astype(bf16), kv_b * vm,
                               preferred_element_type=f32)

    # --- Wo (rows 64:128 hold the real weights) + net FFN([64,64,64,1]) + Tanh
    attn = jnp.dot(ctx.reshape(tb * n_prey, WPAD).astype(bf16), w_ref[5],
                   preferred_element_type=f32) + b_ref[8]
    # out[prey_is_dead].fill_(0.0) is a no-op in the reference (copy semantics).
    h1 = jnp.maximum(jnp.dot(attn.astype(bf16), w_ref[6],
                             preferred_element_type=f32) + b_ref[9], 0.0)
    h2 = jnp.maximum(jnp.dot(h1.astype(bf16), w_ref[7],
                             preferred_element_type=f32) + b_ref[10], 0.0)
    # last Linear(H,1) as a lane reduction; bn3 folded as bn3/128 on every lane
    y = jnp.tanh(jnp.sum(h2 * b_ref[11] + b_ref[12], axis=-1, keepdims=True))
    out_ref[...] = y.reshape(1, 1, tb * n_prey)        # lane-dense store


def init_params(key):
    """Deterministic synthetic parameter init matching the module's shapes."""
    keys = iter(jax.random.split(key, 32))

    def xavier(shape):
        fan_in, fan_out = shape
        std = (2.0 / (fan_in + fan_out)) ** 0.5
        return (std * jax.random.normal(next(keys), shape)).astype(jnp.float32)

    def zeros(shape):
        return jnp.zeros(shape, jnp.float32)

    p = {}
    # seqs: FFN([2,H,H]), FFN([2,H,H]), FFN([3,H,H])
    p['enc'] = [(xavier((in_dim, H)), zeros((1, H)), xavier((H, H)), zeros((1, H)))
                for in_dim in (2, 2, 3)]
    p['emb'] = xavier((3, H))
    # attention: y = x @ W + b convention
    p['wq'], p['bq'] = xavier((H, H)), zeros((1, H))
    p['wk'], p['bk'] = xavier((H, H)), zeros((1, H))
    p['wv'], p['bv'] = xavier((H, H)), zeros((1, H))
    p['wo'], p['bo'] = xavier((H, H)), zeros((1, H))
    # net: Linear(H,H) ReLU Linear(H,H) ReLU Linear(H,1) Tanh; last weight U(-.01,.01)
    p['net'] = [(xavier((H, H)), zeros((1, H))),
                (xavier((H, H)), zeros((1, H))),
                (jax.random.uniform(next(keys), (H, 1), jnp.float32, -0.01, 0.01),
                 zeros((1, 1)))]
    return p


def _pack_params(params):
    """Fold constants and pack all parameters into 3 stacked kernel operands."""
    scale = 1.0 / math.sqrt(HEAD_DIM)
    emb = params['emb']
    enc = params['enc']
    (wn1, bn1), (wn2, bn2), (wn3, bn3) = params['net']

    def pad_w(w, r0=0, c0=0):
        out = jnp.zeros((WPAD, WPAD), jnp.float32)
        return out.at[r0:r0 + w.shape[0], c0:c0 + w.shape[1]].set(w)

    def pad_row(v, c0=0):
        v = v.reshape(-1)
        return jnp.zeros((WPAD,), jnp.float32).at[c0:c0 + v.shape[0]].set(v)

    # first-layer encoder weights: (in_dim,64) -> (8,128), stacked (3,8,128) bf16
    w1_stack = jnp.stack([
        jnp.zeros((F_IN, WPAD), jnp.float32)
           .at[:enc[i][0].shape[0], :H].set(enc[i][0]) for i in range(3)
    ]).astype(jnp.bfloat16)

    wkv = jnp.concatenate([params['wk'], params['wv']], axis=1)   # (64,128)
    w_stack = jnp.stack([
        pad_w(enc[0][2]), pad_w(enc[1][2]), pad_w(enc[2][2]),     # encoder layer 2
        pad_w(params['wq'] * scale),                              # scaled Q proj
        pad_w(wkv),                                               # fused K|V proj
        pad_w(params['wo'], r0=H),                                # Wo shifted to rows 64:128
        pad_w(wn1), pad_w(wn2),                                   # net FFN
    ]).astype(jnp.bfloat16)                                       # (8,128,128)

    b_stack = jnp.stack([
        pad_row(enc[0][1]), pad_row(enc[1][1]), pad_row(enc[2][1]),
        pad_row(enc[0][3] + emb[0:1]),                            # + embedding fold
        pad_row(enc[1][3] + emb[1:2]),
        pad_row(enc[2][3] + emb[2:3]),
        pad_row(params['bq'] * scale),
        pad_row(jnp.concatenate([params['bk'].reshape(-1), params['bv'].reshape(-1)])),
        pad_row(params['bo']),
        pad_row(bn1), pad_row(bn2),
        pad_row(wn3.reshape(1, -1)),                              # last-layer weight row
        jnp.broadcast_to(bn3.reshape(()), (WPAD,)) / WPAD,        # bn3 spread over lanes
    ])                                                            # (13,128) f32
    return w1_stack, w_stack, b_stack


def prey_attn_actor(pred_state, prey_state, obst_state, prey_is_alive, params,
                    *, block_b=128, core_parallel=False):
    B, n_pred, _ = pred_state.shape
    n_prey = prey_state.shape[1]
    n_obst = obst_state.shape[1]
    n_tot = n_pred + n_prey + n_obst

    # batch block: multiple of 8 (sublane aligned) or the whole (small) batch
    if B >= 8:
        tb = max(8, (min(block_b, B) // 8) * 8)
    else:
        tb = B
    B_pad = -(-B // tb) * tb
    nb = B_pad // tb

    def prep(x):
        x = x.astype(jnp.float32)
        return jnp.pad(x, ((0, B_pad - B), (0, 0), (0, F_IN - x.shape[-1])))

    pred = prep(pred_state)
    prey = prep(prey_state)
    obst = prep(obst_state)
    dead = jnp.pad(jnp.logical_not(prey_is_alive).astype(jnp.float32),
                   ((0, B_pad - B), (0, 0)))                      # padded rows: alive

    w1_stack, w_stack, b_stack = _pack_params(params)

    in_specs = [
        pl.BlockSpec((tb, n_pred, F_IN), lambda b: (b, 0, 0)),
        pl.BlockSpec((tb, n_prey, F_IN), lambda b: (b, 0, 0)),
        pl.BlockSpec((tb, n_obst, F_IN), lambda b: (b, 0, 0)),
        pl.BlockSpec((tb, n_prey), lambda b: (b, 0)),
        pl.BlockSpec(w1_stack.shape, lambda b: (0, 0, 0)),
        pl.BlockSpec(w_stack.shape, lambda b: (0, 0, 0)),
        pl.BlockSpec(b_stack.shape, lambda b: (0, 0)),
    ]

    # advisory cost estimate so XLA can overlap this small kernel
    flops = B_pad * 2 * (
        n_tot * (F_IN * WPAD + WPAD * WPAD)             # encoders
        + (n_prey + n_tot) * WPAD * WPAD                # q / kv projections
        + N_HEADS * 2 * n_prey * n_tot * WPAD           # scores + PV
        + n_prey * (3 * WPAD * WPAD + WPAD))            # wo + net FFN
    transcendentals = B_pad * n_prey * (N_HEADS * (n_tot + 1) + 1)
    bytes_accessed = (4 * (pred.size + prey.size + obst.size + dead.size + b_stack.size)
                      + 2 * (w_stack.size + w1_stack.size) + 4 * B_pad * n_prey)

    # On v7x set core_parallel=True so the batch grid is sharded over both TCs.
    dims = (pltpu.CORE_PARALLEL,) if core_parallel else ("parallel",)

    out3 = pl.pallas_call(
        prey_attn_actor_kernel,
        out_shape=jax.ShapeDtypeStruct((nb, 1, tb * n_prey), jnp.float32),
        grid_spec=pltpu.PrefetchScalarGridSpec(
            num_scalar_prefetch=0,
            grid=(nb,),
            in_specs=in_specs,
            out_specs=pl.BlockSpec((1, 1, tb * n_prey), lambda b: (b, 0, 0)),
        ),
        compiler_params=pltpu.CompilerParams(
            dimension_semantics=dims,
            vmem_limit_bytes=48 * 1024 * 1024),
        cost_estimate=pl.CostEstimate(flops=int(flops),
                                      transcendentals=int(transcendentals),
                                      bytes_accessed=int(bytes_accessed)),
    )(pred, prey, obst, dead, w1_stack, w_stack, b_stack)

    # lane-dense kernel output -> reference layout (B, n_prey, 1)
    out = out3.reshape(B_pad, n_prey)[:B]
    return out[:, :, None]


if __name__ == "__main__":
    key = jax.random.PRNGKey(0)
    kp, k1, k2, k3, k4 = jax.random.split(key, 5)

    B, n_pred, n_prey, n_obst = 2, 8, 8, 8
    params = init_params(kp)

    pred_state = jax.random.normal(k1, (B, n_pred, 2), jnp.float32)
    prey_state = jax.random.normal(k2, (B, n_prey, 2), jnp.float32)
    obst_state = jax.random.normal(k3, (B, n_obst, 3), jnp.float32)
    prey_is_alive = jax.random.bernoulli(k4, 0.7, (B, n_prey))

    out = prey_attn_actor(pred_state, prey_state, obst_state, prey_is_alive, params)
    out = jax.block_until_ready(out)
    assert out.shape == (B, n_prey, 1)
    assert bool(jnp.all(jnp.isfinite(out)))
    assert bool(jnp.all(jnp.abs(out) <= 1.0))   # Tanh-bounded output
    print("KERNEL_OK")
</pallas_src>

<mosaic_0001>
module attributes {stable_mosaic.version = 11 : i64} {
  func.func @prey_attn_actor_kernel(%arg0: i32, %arg1: memref<2x8x8xf32, #tpu.memory_space<vmem>>, %arg2: memref<2x8x8xf32, #tpu.memory_space<vmem>>, %arg3: memref<2x8x8xf32, #tpu.memory_space<vmem>>, %arg4: memref<2x8xf32, #tpu.memory_space<vmem>>, %arg5: memref<3x8x128xbf16, #tpu.memory_space<vmem>>, %arg6: memref<8x128x128xbf16, #tpu.memory_space<vmem>>, %arg7: memref<13x128xf32, #tpu.memory_space<vmem>>, %arg8: memref<1x1x16xf32, #tpu.memory_space<vmem>>) attributes {dimension_semantics = [#tpu.dimension_semantics<parallel>], iteration_bounds = array<i64: 1>, scalar_prefetch = 0 : i64, scratch_operands = 0 : i64, tpu.core_type = #tpu.core_type<tc>, window_params = [{transform_indices = @transform_0, window_bounds = array<i64: 2, 8, 8>}, {transform_indices = @transform_1, window_bounds = array<i64: 2, 8, 8>}, {transform_indices = @transform_2, window_bounds = array<i64: 2, 8, 8>}, {transform_indices = @transform_3, window_bounds = array<i64: 2, 8>}, {pipeline_mode = #tpu.pipeline_mode<synchronous>, transform_indices = @transform_4, window_bounds = array<i64: 3, 8, 128>}, {pipeline_mode = #tpu.pipeline_mode<synchronous>, transform_indices = @transform_5, window_bounds = array<i64: 8, 128, 128>}, {pipeline_mode = #tpu.pipeline_mode<synchronous>, transform_indices = @transform_6, window_bounds = array<i64: 13, 128>}, {transform_indices = @transform_7, window_bounds = array<i64: 1, 1, 16>}]} {
    %c0 = arith.constant 0 : index
    %c0_0 = arith.constant 0 : index
    %c0_1 = arith.constant 0 : index
    %0 = vector.load %arg1[%c0, %c0_0, %c0_1] : memref<2x8x8xf32, #tpu.memory_space<vmem>>, vector<2x8x8xf32>
    %1 = vector.shape_cast %0 : vector<2x8x8xf32> to vector<16x8xf32>
    %2 = arith.truncf %1 : vector<16x8xf32> to vector<16x8xbf16>
    %c0_2 = arith.constant 0 : index
    %c0_3 = arith.constant 0 : index
    %c0_4 = arith.constant 0 : index
    %3 = vector.load %arg5[%c0_2, %c0_3, %c0_4] : memref<3x8x128xbf16, #tpu.memory_space<vmem>>, vector<1x8x128xbf16>
    %4 = vector.shape_cast %3 : vector<1x8x128xbf16> to vector<8x128xbf16>
    %cst = arith.constant dense<0.000000e+00> : vector<16x128xf32>
    %5 = tpu.matmul %2, %4, %cst {dimension_numbers = #tpu.dot_dimension_numbers<[1], [0], [0], [1], [0, 0, 1, 1], [], []>} : vector<16x8xbf16>, vector<8x128xbf16>, vector<16x128xf32> -> vector<16x128xf32>
    %c0_5 = arith.constant 0 : index
    %c0_6 = arith.constant 0 : index
    %6 = vector.load %arg7[%c0_5, %c0_6] : memref<13x128xf32, #tpu.memory_space<vmem>>, vector<1x128xf32>
    %7 = vector.shape_cast %6 : vector<1x128xf32> to vector<128xf32>
    %8 = vector.shape_cast %7 : vector<128xf32> to vector<1x128xf32>
    %9 = vector.broadcast %8 : vector<1x128xf32> to vector<16x128xf32>
    %10 = arith.addf %5, %9 : vector<16x128xf32>
    %cst_7 = arith.constant 0.000000e+00 : f32
    %11 = vector.broadcast %cst_7 : f32 to vector<16x128xf32>
    %12 = arith.maximumf %10, %11 : vector<16x128xf32>
    %13 = arith.truncf %12 : vector<16x128xf32> to vector<16x128xbf16>
    %c0_8 = arith.constant 0 : index
    %c0_9 = arith.constant 0 : index
    %c0_10 = arith.constant 0 : index
    %14 = vector.load %arg6[%c0_8, %c0_9, %c0_10] : memref<8x128x128xbf16, #tpu.memory_space<vmem>>, vector<1x128x128xbf16>
    %15 = vector.shape_cast %14 : vector<1x128x128xbf16> to vector<128x128xbf16>
    %cst_11 = arith.constant dense<0.000000e+00> : vector<16x128xf32>
    %16 = tpu.matmul %13, %15, %cst_11 {dimension_numbers = #tpu.dot_dimension_numbers<[1], [0], [0], [1], [0, 0, 1, 1], [], []>} : vector<16x128xbf16>, vector<128x128xbf16>, vector<16x128xf32> -> vector<16x128xf32>
    %c3 = arith.constant 3 : index
    %c0_12 = arith.constant 0 : index
    %17 = vector.load %arg7[%c3, %c0_12] : memref<13x128xf32, #tpu.memory_space<vmem>>, vector<1x128xf32>
    %18 = vector.shape_cast %17 : vector<1x128xf32> to vector<128xf32>
    %19 = vector.shape_cast %18 : vector<128xf32> to vector<1x128xf32>
    %20 = vector.broadcast %19 : vector<1x128xf32> to vector<16x128xf32>
    %21 = arith.addf %16, %20 : vector<16x128xf32>
    %22 = vector.shape_cast %21 : vector<16x128xf32> to vector<2x8x128xf32>
    %c0_13 = arith.constant 0 : index
    %c0_14 = arith.constant 0 : index
    %c0_15 = arith.constant 0 : index
    %23 = vector.load %arg2[%c0_13, %c0_14, %c0_15] : memref<2x8x8xf32, #tpu.memory_space<vmem>>, vector<2x8x8xf32>
    %24 = vector.shape_cast %23 : vector<2x8x8xf32> to vector<16x8xf32>
    %25 = arith.truncf %24 : vector<16x8xf32> to vector<16x8xbf16>
    %c1 = arith.constant 1 : index
    %c0_16 = arith.constant 0 : index
    %c0_17 = arith.constant 0 : index
    %26 = vector.load %arg5[%c1, %c0_16, %c0_17] : memref<3x8x128xbf16, #tpu.memory_space<vmem>>, vector<1x8x128xbf16>
    %27 = vector.shape_cast %26 : vector<1x8x128xbf16> to vector<8x128xbf16>
    %cst_18 = arith.constant dense<0.000000e+00> : vector<16x128xf32>
    %28 = tpu.matmul %25, %27, %cst_18 {dimension_numbers = #tpu.dot_dimension_numbers<[1], [0], [0], [1], [0, 0, 1, 1], [], []>} : vector<16x8xbf16>, vector<8x128xbf16>, vector<16x128xf32> -> vector<16x128xf32>
    %c1_19 = arith.constant 1 : index
    %c0_20 = arith.constant 0 : index
    %29 = vector.load %arg7[%c1_19, %c0_20] : memref<13x128xf32, #tpu.memory_space<vmem>>, vector<1x128xf32>
    %30 = vector.shape_cast %29 : vector<1x128xf32> to vector<128xf32>
    %31 = vector.shape_cast %30 : vector<128xf32> to vector<1x128xf32>
    %32 = vector.broadcast %31 : vector<1x128xf32> to vector<16x128xf32>
    %33 = arith.addf %28, %32 : vector<16x128xf32>
    %cst_21 = arith.constant 0.000000e+00 : f32
    %34 = vector.broadcast %cst_21 : f32 to vector<16x128xf32>
    %35 = arith.maximumf %33, %34 : vector<16x128xf32>
    %36 = arith.truncf %35 : vector<16x128xf32> to vector<16x128xbf16>
    %c1_22 = arith.constant 1 : index
    %c0_23 = arith.constant 0 : index
    %c0_24 = arith.constant 0 : index
    %37 = vector.load %arg6[%c1_22, %c0_23, %c0_24] : memref<8x128x128xbf16, #tpu.memory_space<vmem>>, vector<1x128x128xbf16>
    %38 = vector.shape_cast %37 : vector<1x128x128xbf16> to vector<128x128xbf16>
    %cst_25 = arith.constant dense<0.000000e+00> : vector<16x128xf32>
    %39 = tpu.matmul %36, %38, %cst_25 {dimension_numbers = #tpu.dot_dimension_numbers<[1], [0], [0], [1], [0, 0, 1, 1], [], []>} : vector<16x128xbf16>, vector<128x128xbf16>, vector<16x128xf32> -> vector<16x128xf32>
    %c4 = arith.constant 4 : index
    %c0_26 = arith.constant 0 : index
    %40 = vector.load %arg7[%c4, %c0_26] : memref<13x128xf32, #tpu.memory_space<vmem>>, vector<1x128xf32>
    %41 = vector.shape_cast %40 : vector<1x128xf32> to vector<128xf32>
    %42 = vector.shape_cast %41 : vector<128xf32> to vector<1x128xf32>
    %43 = vector.broadcast %42 : vector<1x128xf32> to vector<16x128xf32>
    %44 = arith.addf %39, %43 : vector<16x128xf32>
    %c0_27 = arith.constant 0 : index
    %c0_28 = arith.constant 0 : index
    %c0_29 = arith.constant 0 : index
    %45 = vector.load %arg3[%c0_27, %c0_28, %c0_29] : memref<2x8x8xf32, #tpu.memory_space<vmem>>, vector<2x8x8xf32>
    %46 = vector.shape_cast %45 : vector<2x8x8xf32> to vector<16x8xf32>
    %47 = arith.truncf %46 : vector<16x8xf32> to vector<16x8xbf16>
    %c2 = arith.constant 2 : index
    %c0_30 = arith.constant 0 : index
    %c0_31 = arith.constant 0 : index
    %48 = vector.load %arg5[%c2, %c0_30, %c0_31] : memref<3x8x128xbf16, #tpu.memory_space<vmem>>, vector<1x8x128xbf16>
    %49 = vector.shape_cast %48 : vector<1x8x128xbf16> to vector<8x128xbf16>
    %cst_32 = arith.constant dense<0.000000e+00> : vector<16x128xf32>
    %50 = tpu.matmul %47, %49, %cst_32 {dimension_numbers = #tpu.dot_dimension_numbers<[1], [0], [0], [1], [0, 0, 1, 1], [], []>} : vector<16x8xbf16>, vector<8x128xbf16>, vector<16x128xf32> -> vector<16x128xf32>
    %c2_33 = arith.constant 2 : index
    %c0_34 = arith.constant 0 : index
    %51 = vector.load %arg7[%c2_33, %c0_34] : memref<13x128xf32, #tpu.memory_space<vmem>>, vector<1x128xf32>
    %52 = vector.shape_cast %51 : vector<1x128xf32> to vector<128xf32>
    %53 = vector.shape_cast %52 : vector<128xf32> to vector<1x128xf32>
    %54 = vector.broadcast %53 : vector<1x128xf32> to vector<16x128xf32>
    %55 = arith.addf %50, %54 : vector<16x128xf32>
    %cst_35 = arith.constant 0.000000e+00 : f32
    %56 = vector.broadcast %cst_35 : f32 to vector<16x128xf32>
    %57 = arith.maximumf %55, %56 : vector<16x128xf32>
    %58 = arith.truncf %57 : vector<16x128xf32> to vector<16x128xbf16>
    %c2_36 = arith.constant 2 : index
    %c0_37 = arith.constant 0 : index
    %c0_38 = arith.constant 0 : index
    %59 = vector.load %arg6[%c2_36, %c0_37, %c0_38] : memref<8x128x128xbf16, #tpu.memory_space<vmem>>, vector<1x128x128xbf16>
    %60 = vector.shape_cast %59 : vector<1x128x128xbf16> to vector<128x128xbf16>
    %cst_39 = arith.constant dense<0.000000e+00> : vector<16x128xf32>
    %61 = tpu.matmul %58, %60, %cst_39 {dimension_numbers = #tpu.dot_dimension_numbers<[1], [0], [0], [1], [0, 0, 1, 1], [], []>} : vector<16x128xbf16>, vector<128x128xbf16>, vector<16x128xf32> -> vector<16x128xf32>
    %c5 = arith.constant 5 : index
    %c0_40 = arith.constant 0 : index
    %62 = vector.load %arg7[%c5, %c0_40] : memref<13x128xf32, #tpu.memory_space<vmem>>, vector<1x128xf32>
    %63 = vector.shape_cast %62 : vector<1x128xf32> to vector<128xf32>
    %64 = vector.shape_cast %63 : vector<128xf32> to vector<1x128xf32>
    %65 = vector.broadcast %64 : vector<1x128xf32> to vector<16x128xf32>
    %66 = arith.addf %61, %65 : vector<16x128xf32>
    %67 = vector.shape_cast %66 : vector<16x128xf32> to vector<2x8x128xf32>
    %68 = vector.shape_cast %44 : vector<16x128xf32> to vector<2x8x128xf32>
    %69 = tpu.concatenate %22, %68, %67 in 1 : vector<2x8x128xf32>, vector<2x8x128xf32>, vector<2x8x128xf32> -> vector<2x24x128xf32>
    %70 = arith.truncf %44 : vector<16x128xf32> to vector<16x128xbf16>
    %c3_41 = arith.constant 3 : index
    %c0_42 = arith.constant 0 : index
    %c0_43 = arith.constant 0 : index
    %71 = vector.load %arg6[%c3_41, %c0_42, %c0_43] : memref<8x128x128xbf16, #tpu.memory_space<vmem>>, vector<1x128x128xbf16>
    %72 = vector.shape_cast %71 : vector<1x128x128xbf16> to vector<128x128xbf16>
    %cst_44 = arith.constant dense<0.000000e+00> : vector<16x128xf32>
    %73 = tpu.matmul %70, %72, %cst_44 {dimension_numbers = #tpu.dot_dimension_numbers<[1], [0], [0], [1], [0, 0, 1, 1], [], []>} : vector<16x128xbf16>, vector<128x128xbf16>, vector<16x128xf32> -> vector<16x128xf32>
    %c6 = arith.constant 6 : index
    %c0_45 = arith.constant 0 : index
    %74 = vector.load %arg7[%c6, %c0_45] : memref<13x128xf32, #tpu.memory_space<vmem>>, vector<1x128xf32>
    %75 = vector.shape_cast %74 : vector<1x128xf32> to vector<128xf32>
    %76 = vector.shape_cast %75 : vector<128xf32> to vector<1x128xf32>
    %77 = vector.broadcast %76 : vector<1x128xf32> to vector<16x128xf32>
    %78 = arith.addf %73, %77 : vector<16x128xf32>
    %79 = vector.shape_cast %69 : vector<2x24x128xf32> to vector<48x128xf32>
    %80 = arith.truncf %79 : vector<48x128xf32> to vector<48x128xbf16>
    %c4_46 = arith.constant 4 : index
    %c0_47 = arith.constant 0 : index
    %c0_48 = arith.constant 0 : index
    %81 = vector.load %arg6[%c4_46, %c0_47, %c0_48] : memref<8x128x128xbf16, #tpu.memory_space<vmem>>, vector<1x128x128xbf16>
    %82 = vector.shape_cast %81 : vector<1x128x128xbf16> to vector<128x128xbf16>
    %cst_49 = arith.constant dense<0.000000e+00> : vector<48x128xf32>
    %83 = tpu.matmul %80, %82, %cst_49 {dimension_numbers = #tpu.dot_dimension_numbers<[1], [0], [0], [1], [0, 0, 1, 1], [], []>} : vector<48x128xbf16>, vector<128x128xbf16>, vector<48x128xf32> -> vector<48x128xf32>
    %c7 = arith.constant 7 : index
    %c0_50 = arith.constant 0 : index
    %84 = vector.load %arg7[%c7, %c0_50] : memref<13x128xf32, #tpu.memory_space<vmem>>, vector<1x128xf32>
    %85 = vector.shape_cast %84 : vector<1x128xf32> to vector<128xf32>
    %86 = vector.shape_cast %85 : vector<128xf32> to vector<1x128xf32>
    %87 = vector.broadcast %86 : vector<1x128xf32> to vector<48x128xf32>
    %88 = arith.addf %83, %87 : vector<48x128xf32>
    %89 = vector.shape_cast %78 : vector<16x128xf32> to vector<2x8x128xf32>
    %90 = arith.truncf %89 : vector<2x8x128xf32> to vector<2x8x128xbf16>
    %91 = vector.shape_cast %88 : vector<48x128xf32> to vector<2x24x128xf32>
    %92 = arith.truncf %91 : vector<2x24x128xf32> to vector<2x24x128xbf16>
    %c0_51 = arith.constant 0 : index
    %c0_52 = arith.constant 0 : index
    %93 = vector.load %arg4[%c0_51, %c0_52] : memref<2x8xf32, #tpu.memory_space<vmem>>, vector<2x8xf32>
    %cst_53 = arith.constant 0.000000e+00 : f32
    %94 = vector.broadcast %cst_53 : f32 to vector<2x8xf32>
    %cst_54 = arith.constant 0.000000e+00 : f32
    %95 = vector.broadcast %cst_54 : f32 to vector<2x8xf32>
    %96 = tpu.concatenate %94, %93, %95 in 1 : vector<2x8xf32>, vector<2x8xf32>, vector<2x8xf32> -> vector<2x24xf32>
    %97 = vector.shape_cast %93 : vector<2x8xf32> to vector<2x8x1xf32>
    %cst_55 = arith.constant -1.000000e+09 : f32
    %98 = vector.broadcast %cst_55 : f32 to vector<2x24xf32>
    %99 = arith.mulf %96, %98 : vector<2x24xf32>
    %100 = vector.shape_cast %99 : vector<2x24xf32> to vector<2x1x24xf32>
    %101 = vector.broadcast %97 : vector<2x8x1xf32> to vector<2x8x24xf32>
    %102 = vector.broadcast %100 : vector<2x1x24xf32> to vector<2x8x24xf32>
    %103 = arith.mulf %101, %102 : vector<2x8x24xf32>
    %104 = tpu.iota {dimensions = array<i32: 2>} : vector<1x1x128xi32>
    %cst_56 = arith.constant 0.000000e+00 : f32
    %105 = vector.broadcast %cst_56 : f32 to vector<2x8x128xf32>
    %c0_i32 = arith.constant 0 : i32
    %106 = vector.broadcast %c0_i32 : i32 to vector<1x1x128xi32>
    %107 = arith.cmpi sge, %104, %106 : vector<1x1x128xi32>
    %c16_i32 = arith.constant 16 : i32
    %108 = vector.broadcast %c16_i32 : i32 to vector<1x1x128xi32>
    %109 = arith.cmpi slt, %104, %108 : vector<1x1x128xi32>
    %110 = arith.andi %107, %109 : vector<1x1x128xi1>
    %111 = arith.extui %110 : vector<1x1x128xi1> to vector<1x1x128xi32>
    %112 = arith.sitofp %111 : vector<1x1x128xi32> to vector<1x1x128xf32>
    %113 = arith.truncf %112 : vector<1x1x128xf32> to vector<1x1x128xbf16>
    %c64_i32 = arith.constant 64 : i32
    %114 = vector.broadcast %c64_i32 : i32 to vector<1x1x128xi32>
    %115 = arith.cmpi sge, %104, %114 : vector<1x1x128xi32>
    %c80_i32 = arith.constant 80 : i32
    %116 = vector.broadcast %c80_i32 : i32 to vector<1x1x128xi32>
    %117 = arith.cmpi slt, %104, %116 : vector<1x1x128xi32>
    %118 = arith.andi %115, %117 : vector<1x1x128xi1>
    %119 = arith.extui %118 : vector<1x1x128xi1> to vector<1x1x128xi32>
    %120 = arith.sitofp %119 : vector<1x1x128xi32> to vector<1x1x128xf32>
    %121 = arith.truncf %120 : vector<1x1x128xf32> to vector<1x1x128xbf16>
    %122 = vector.broadcast %113 : vector<1x1x128xbf16> to vector<2x8x128xbf16>
    %123 = arith.mulf %90, %122 : vector<2x8x128xbf16>
    "tpu.trace_start"() <{level = 10 : i32, message = "bqd,bkd->bqk"}> : () -> ()
    %cst_57 = arith.constant dense<0.000000e+00> : vector<2x8x24xf32>
    %124 = tpu.matmul %123, %92, %cst_57 {dimension_numbers = #tpu.dot_dimension_numbers<[2], [2], [1], [1], [0, 0, 0, 1, 1, 1], [0], [0]>} : vector<2x8x128xbf16>, vector<2x24x128xbf16>, vector<2x8x24xf32> -> vector<2x8x24xf32>
    "tpu.trace_stop"() : () -> ()
    %125 = arith.addf %124, %103 : vector<2x8x24xf32>
    %cst_58 = arith.constant dense<0xFF800000> : vector<2x8xf32>
    %126 = vector.multi_reduction <maximumf>, %125, %cst_58 [2] : vector<2x8x24xf32> to vector<2x8xf32>
    %127 = vector.shape_cast %126 : vector<2x8xf32> to vector<2x8x1xf32>
    %128 = vector.broadcast %127 : vector<2x8x1xf32> to vector<2x8x24xf32>
    %129 = arith.subf %125, %128 : vector<2x8x24xf32>
    %130 = math.exp %129 : vector<2x8x24xf32>
    %cst_59 = arith.constant dense<0.000000e+00> : vector<2x8xf32>
    %131 = vector.multi_reduction <add>, %130, %cst_59 [2] : vector<2x8x24xf32> to vector<2x8xf32>
    %132 = vector.shape_cast %131 : vector<2x8xf32> to vector<2x8x1xf32>
    %133 = tpu.reciprocal %132 {approx = true} : vector<2x8x1xf32> -> vector<2x8x1xf32>
    %134 = vector.broadcast %133 : vector<2x8x1xf32> to vector<2x8x24xf32>
    %135 = arith.mulf %130, %134 : vector<2x8x24xf32>
    %136 = arith.truncf %135 : vector<2x8x24xf32> to vector<2x8x24xbf16>
    %137 = vector.broadcast %121 : vector<1x1x128xbf16> to vector<2x24x128xbf16>
    %138 = arith.mulf %92, %137 : vector<2x24x128xbf16>
    "tpu.trace_start"() <{level = 10 : i32, message = "bqk,bkd->bqd"}> : () -> ()
    %cst_60 = arith.constant dense<0.000000e+00> : vector<2x8x128xf32>
    %139 = tpu.matmul %136, %138, %cst_60 {dimension_numbers = #tpu.dot_dimension_numbers<[2], [1], [1], [2], [0, 0, 0, 1, 1, 2], [0], [0]>} : vector<2x8x24xbf16>, vector<2x24x128xbf16>, vector<2x8x128xf32> -> vector<2x8x128xf32>
    "tpu.trace_stop"() : () -> ()
    %140 = arith.addf %105, %139 : vector<2x8x128xf32>
    %c16_i32_61 = arith.constant 16 : i32
    %141 = vector.broadcast %c16_i32_61 : i32 to vector<1x1x128xi32>
    %142 = arith.cmpi sge, %104, %141 : vector<1x1x128xi32>
    %c32_i32 = arith.constant 32 : i32
    %143 = vector.broadcast %c32_i32 : i32 to vector<1x1x128xi32>
    %144 = arith.cmpi slt, %104, %143 : vector<1x1x128xi32>
    %145 = arith.andi %142, %144 : vector<1x1x128xi1>
    %146 = arith.extui %145 : vector<1x1x128xi1> to vector<1x1x128xi32>
    %147 = arith.sitofp %146 : vector<1x1x128xi32> to vector<1x1x128xf32>
    %148 = arith.truncf %147 : vector<1x1x128xf32> to vector<1x1x128xbf16>
    %c80_i32_62 = arith.constant 80 : i32
    %149 = vector.broadcast %c80_i32_62 : i32 to vector<1x1x128xi32>
    %150 = arith.cmpi sge, %104, %149 : vector<1x1x128xi32>
    %c96_i32 = arith.constant 96 : i32
    %151 = vector.broadcast %c96_i32 : i32 to vector<1x1x128xi32>
    %152 = arith.cmpi slt, %104, %151 : vector<1x1x128xi32>
    %153 = arith.andi %150, %152 : vector<1x1x128xi1>
    %154 = arith.extui %153 : vector<1x1x128xi1> to vector<1x1x128xi32>
    %155 = arith.sitofp %154 : vector<1x1x128xi32> to vector<1x1x128xf32>
    %156 = arith.truncf %155 : vector<1x1x128xf32> to vector<1x1x128xbf16>
    %157 = vector.broadcast %148 : vector<1x1x128xbf16> to vector<2x8x128xbf16>
    %158 = arith.mulf %90, %157 : vector<2x8x128xbf16>
    "tpu.trace_start"() <{level = 10 : i32, message = "bqd,bkd->bqk"}> : () -> ()
    %cst_63 = arith.constant dense<0.000000e+00> : vector<2x8x24xf32>
    %159 = tpu.matmul %158, %92, %cst_63 {dimension_numbers = #tpu.dot_dimension_numbers<[2], [2], [1], [1], [0, 0, 0, 1, 1, 1], [0], [0]>} : vector<2x8x128xbf16>, vector<2x24x128xbf16>, vector<2x8x24xf32> -> vector<2x8x24xf32>
    "tpu.trace_stop"() : () -> ()
    %160 = arith.addf %159, %103 : vector<2x8x24xf32>
    %cst_64 = arith.constant dense<0xFF800000> : vector<2x8xf32>
    %161 = vector.multi_reduction <maximumf>, %160, %cst_64 [2] : vector<2x8x24xf32> to vector<2x8xf32>
    %162 = vector.shape_cast %161 : vector<2x8xf32> to vector<2x8x1xf32>
    %163 = vector.broadcast %162 : vector<2x8x1xf32> to vector<2x8x24xf32>
    %164 = arith.subf %160, %163 : vector<2x8x24xf32>
    %165 = math.exp %164 : vector<2x8x24xf32>
    %cst_65 = arith.constant dense<0.000000e+00> : vector<2x8xf32>
    %166 = vector.multi_reduction <add>, %165, %cst_65 [2] : vector<2x8x24xf32> to vector<2x8xf32>
    %167 = vector.shape_cast %166 : vector<2x8xf32> to vector<2x8x1xf32>
    %168 = tpu.reciprocal %167 {approx = true} : vector<2x8x1xf32> -> vector<2x8x1xf32>
    %169 = vector.broadcast %168 : vector<2x8x1xf32> to vector<2x8x24xf32>
    %170 = arith.mulf %165, %169 : vector<2x8x24xf32>
    %171 = arith.truncf %170 : vector<2x8x24xf32> to vector<2x8x24xbf16>
    %172 = vector.broadcast %156 : vector<1x1x128xbf16> to vector<2x24x128xbf16>
    %173 = arith.mulf %92, %172 : vector<2x24x128xbf16>
    "tpu.trace_start"() <{level = 10 : i32, message = "bqk,bkd->bqd"}> : () -> ()
    %cst_66 = arith.constant dense<0.000000e+00> : vector<2x8x128xf32>
    %174 = tpu.matmul %171, %173, %cst_66 {dimension_numbers = #tpu.dot_dimension_numbers<[2], [1], [1], [2], [0, 0, 0, 1, 1, 2], [0], [0]>} : vector<2x8x24xbf16>, vector<2x24x128xbf16>, vector<2x8x128xf32> -> vector<2x8x128xf32>
    "tpu.trace_stop"() : () -> ()
    %175 = arith.addf %140, %174 : vector<2x8x128xf32>
    %c32_i32_67 = arith.constant 32 : i32
    %176 = vector.broadcast %c32_i32_67 : i32 to vector<1x1x128xi32>
    %177 = arith.cmpi sge, %104, %176 : vector<1x1x128xi32>
    %c48_i32 = arith.constant 48 : i32
    %178 = vector.broadcast %c48_i32 : i32 to vector<1x1x128xi32>
    %179 = arith.cmpi slt, %104, %178 : vector<1x1x128xi32>
    %180 = arith.andi %177, %179 : vector<1x1x128xi1>
    %181 = arith.extui %180 : vector<1x1x128xi1> to vector<1x1x128xi32>
    %182 = arith.sitofp %181 : vector<1x1x128xi32> to vector<1x1x128xf32>
    %183 = arith.truncf %182 : vector<1x1x128xf32> to vector<1x1x128xbf16>
    %c96_i32_68 = arith.constant 96 : i32
    %184 = vector.broadcast %c96_i32_68 : i32 to vector<1x1x128xi32>
    %185 = arith.cmpi sge, %104, %184 : vector<1x1x128xi32>
    %c112_i32 = arith.constant 112 : i32
    %186 = vector.broadcast %c112_i32 : i32 to vector<1x1x128xi32>
    %187 = arith.cmpi slt, %104, %186 : vector<1x1x128xi32>
    %188 = arith.andi %185, %187 : vector<1x1x128xi1>
    %189 = arith.extui %188 : vector<1x1x128xi1> to vector<1x1x128xi32>
    %190 = arith.sitofp %189 : vector<1x1x128xi32> to vector<1x1x128xf32>
    %191 = arith.truncf %190 : vector<1x1x128xf32> to vector<1x1x128xbf16>
    %192 = vector.broadcast %183 : vector<1x1x128xbf16> to vector<2x8x128xbf16>
    %193 = arith.mulf %90, %192 : vector<2x8x128xbf16>
    "tpu.trace_start"() <{level = 10 : i32, message = "bqd,bkd->bqk"}> : () -> ()
    %cst_69 = arith.constant dense<0.000000e+00> : vector<2x8x24xf32>
    %194 = tpu.matmul %193, %92, %cst_69 {dimension_numbers = #tpu.dot_dimension_numbers<[2], [2], [1], [1], [0, 0, 0, 1, 1, 1], [0], [0]>} : vector<2x8x128xbf16>, vector<2x24x128xbf16>, vector<2x8x24xf32> -> vector<2x8x24xf32>
    "tpu.trace_stop"() : () -> ()
    %195 = arith.addf %194, %103 : vector<2x8x24xf32>
    %cst_70 = arith.constant dense<0xFF800000> : vector<2x8xf32>
    %196 = vector.multi_reduction <maximumf>, %195, %cst_70 [2] : vector<2x8x24xf32> to vector<2x8xf32>
    %197 = vector.shape_cast %196 : vector<2x8xf32> to vector<2x8x1xf32>
    %198 = vector.broadcast %197 : vector<2x8x1xf32> to vector<2x8x24xf32>
    %199 = arith.subf %195, %198 : vector<2x8x24xf32>
    %200 = math.exp %199 : vector<2x8x24xf32>
    %cst_71 = arith.constant dense<0.000000e+00> : vector<2x8xf32>
    %201 = vector.multi_reduction <add>, %200, %cst_71 [2] : vector<2x8x24xf32> to vector<2x8xf32>
    %202 = vector.shape_cast %201 : vector<2x8xf32> to vector<2x8x1xf32>
    %203 = tpu.reciprocal %202 {approx = true} : vector<2x8x1xf32> -> vector<2x8x1xf32>
    %204 = vector.broadcast %203 : vector<2x8x1xf32> to vector<2x8x24xf32>
    %205 = arith.mulf %200, %204 : vector<2x8x24xf32>
    %206 = arith.truncf %205 : vector<2x8x24xf32> to vector<2x8x24xbf16>
    %207 = vector.broadcast %191 : vector<1x1x128xbf16> to vector<2x24x128xbf16>
    %208 = arith.mulf %92, %207 : vector<2x24x128xbf16>
    "tpu.trace_start"() <{level = 10 : i32, message = "bqk,bkd->bqd"}> : () -> ()
    %cst_72 = arith.constant dense<0.000000e+00> : vector<2x8x128xf32>
    %209 = tpu.matmul %206, %208, %cst_72 {dimension_numbers = #tpu.dot_dimension_numbers<[2], [1], [1], [2], [0, 0, 0, 1, 1, 2], [0], [0]>} : vector<2x8x24xbf16>, vector<2x24x128xbf16>, vector<2x8x128xf32> -> vector<2x8x128xf32>
    "tpu.trace_stop"() : () -> ()
    %210 = arith.addf %175, %209 : vector<2x8x128xf32>
    %c48_i32_73 = arith.constant 48 : i32
    %211 = vector.broadcast %c48_i32_73 : i32 to vector<1x1x128xi32>
    %212 = arith.cmpi sge, %104, %211 : vector<1x1x128xi32>
    %c64_i32_74 = arith.constant 64 : i32
    %213 = vector.broadcast %c64_i32_74 : i32 to vector<1x1x128xi32>
    %214 = arith.cmpi slt, %104, %213 : vector<1x1x128xi32>
    %215 = arith.andi %212, %214 : vector<1x1x128xi1>
    %216 = arith.extui %215 : vector<1x1x128xi1> to vector<1x1x128xi32>
    %217 = arith.sitofp %216 : vector<1x1x128xi32> to vector<1x1x128xf32>
    %218 = arith.truncf %217 : vector<1x1x128xf32> to vector<1x1x128xbf16>
    %c112_i32_75 = arith.constant 112 : i32
    %219 = vector.broadcast %c112_i32_75 : i32 to vector<1x1x128xi32>
    %220 = arith.cmpi sge, %104, %219 : vector<1x1x128xi32>
    %c128_i32 = arith.constant 128 : i32
    %221 = vector.broadcast %c128_i32 : i32 to vector<1x1x128xi32>
    %222 = arith.cmpi slt, %104, %221 : vector<1x1x128xi32>
    %223 = arith.andi %220, %222 : vector<1x1x128xi1>
    %224 = arith.extui %223 : vector<1x1x128xi1> to vector<1x1x128xi32>
    %225 = arith.sitofp %224 : vector<1x1x128xi32> to vector<1x1x128xf32>
    %226 = arith.truncf %225 : vector<1x1x128xf32> to vector<1x1x128xbf16>
    %227 = vector.broadcast %218 : vector<1x1x128xbf16> to vector<2x8x128xbf16>
    %228 = arith.mulf %90, %227 : vector<2x8x128xbf16>
    "tpu.trace_start"() <{level = 10 : i32, message = "bqd,bkd->bqk"}> : () -> ()
    %cst_76 = arith.constant dense<0.000000e+00> : vector<2x8x24xf32>
    %229 = tpu.matmul %228, %92, %cst_76 {dimension_numbers = #tpu.dot_dimension_numbers<[2], [2], [1], [1], [0, 0, 0, 1, 1, 1], [0], [0]>} : vector<2x8x128xbf16>, vector<2x24x128xbf16>, vector<2x8x24xf32> -> vector<2x8x24xf32>
    "tpu.trace_stop"() : () -> ()
    %230 = arith.addf %229, %103 : vector<2x8x24xf32>
    %cst_77 = arith.constant dense<0xFF800000> : vector<2x8xf32>
    %231 = vector.multi_reduction <maximumf>, %230, %cst_77 [2] : vector<2x8x24xf32> to vector<2x8xf32>
    %232 = vector.shape_cast %231 : vector<2x8xf32> to vector<2x8x1xf32>
    %233 = vector.broadcast %232 : vector<2x8x1xf32> to vector<2x8x24xf32>
    %234 = arith.subf %230, %233 : vector<2x8x24xf32>
    %235 = math.exp %234 : vector<2x8x24xf32>
    %cst_78 = arith.constant dense<0.000000e+00> : vector<2x8xf32>
    %236 = vector.multi_reduction <add>, %235, %cst_78 [2] : vector<2x8x24xf32> to vector<2x8xf32>
    %237 = vector.shape_cast %236 : vector<2x8xf32> to vector<2x8x1xf32>
    %238 = tpu.reciprocal %237 {approx = true} : vector<2x8x1xf32> -> vector<2x8x1xf32>
    %239 = vector.broadcast %238 : vector<2x8x1xf32> to vector<2x8x24xf32>
    %240 = arith.mulf %235, %239 : vector<2x8x24xf32>
    %241 = arith.truncf %240 : vector<2x8x24xf32> to vector<2x8x24xbf16>
    %242 = vector.broadcast %226 : vector<1x1x128xbf16> to vector<2x24x128xbf16>
    %243 = arith.mulf %92, %242 : vector<2x24x128xbf16>
    "tpu.trace_start"() <{level = 10 : i32, message = "bqk,bkd->bqd"}> : () -> ()
    %cst_79 = arith.constant dense<0.000000e+00> : vector<2x8x128xf32>
    %244 = tpu.matmul %241, %243, %cst_79 {dimension_numbers = #tpu.dot_dimension_numbers<[2], [1], [1], [2], [0, 0, 0, 1, 1, 2], [0], [0]>} : vector<2x8x24xbf16>, vector<2x24x128xbf16>, vector<2x8x128xf32> -> vector<2x8x128xf32>
    "tpu.trace_stop"() : () -> ()
    %245 = arith.addf %210, %244 : vector<2x8x128xf32>
    %246 = vector.shape_cast %245 : vector<2x8x128xf32> to vector<16x128xf32>
    %247 = arith.truncf %246 : vector<16x128xf32> to vector<16x128xbf16>
    %c5_80 = arith.constant 5 : index
    %c0_81 = arith.constant 0 : index
    %c0_82 = arith.constant 0 : index
    %248 = vector.load %arg6[%c5_80, %c0_81, %c0_82] : memref<8x128x128xbf16, #tpu.memory_space<vmem>>, vector<1x128x128xbf16>
    %249 = vector.shape_cast %248 : vector<1x128x128xbf16> to vector<128x128xbf16>
    %cst_83 = arith.constant dense<0.000000e+00> : vector<16x128xf32>
    %250 = tpu.matmul %247, %249, %cst_83 {dimension_numbers = #tpu.dot_dimension_numbers<[1], [0], [0], [1], [0, 0, 1, 1], [], []>} : vector<16x128xbf16>, vector<128x128xbf16>, vector<16x128xf32> -> vector<16x128xf32>
    %c8 = arith.constant 8 : index
    %c0_84 = arith.constant 0 : index
    %251 = vector.load %arg7[%c8, %c0_84] : memref<13x128xf32, #tpu.memory_space<vmem>>, vector<1x128xf32>
    %252 = vector.shape_cast %251 : vector<1x128xf32> to vector<128xf32>
    %253 = vector.shape_cast %252 : vector<128xf32> to vector<1x128xf32>
    %254 = vector.broadcast %253 : vector<1x128xf32> to vector<16x128xf32>
    %255 = arith.addf %250, %254 : vector<16x128xf32>
    %256 = arith.truncf %255 : vector<16x128xf32> to vector<16x128xbf16>
    %c6_85 = arith.constant 6 : index
    %c0_86 = arith.constant 0 : index
    %c0_87 = arith.constant 0 : index
    %257 = vector.load %arg6[%c6_85, %c0_86, %c0_87] : memref<8x128x128xbf16, #tpu.memory_space<vmem>>, vector<1x128x128xbf16>
    %258 = vector.shape_cast %257 : vector<1x128x128xbf16> to vector<128x128xbf16>
    %cst_88 = arith.constant dense<0.000000e+00> : vector<16x128xf32>
    %259 = tpu.matmul %256, %258, %cst_88 {dimension_numbers = #tpu.dot_dimension_numbers<[1], [0], [0], [1], [0, 0, 1, 1], [], []>} : vector<16x128xbf16>, vector<128x128xbf16>, vector<16x128xf32> -> vector<16x128xf32>
    %c9 = arith.constant 9 : index
    %c0_89 = arith.constant 0 : index
    %260 = vector.load %arg7[%c9, %c0_89] : memref<13x128xf32, #tpu.memory_space<vmem>>, vector<1x128xf32>
    %261 = vector.shape_cast %260 : vector<1x128xf32> to vector<128xf32>
    %262 = vector.shape_cast %261 : vector<128xf32> to vector<1x128xf32>
    %263 = vector.broadcast %262 : vector<1x128xf32> to vector<16x128xf32>
    %264 = arith.addf %259, %263 : vector<16x128xf32>
    %cst_90 = arith.constant 0.000000e+00 : f32
    %265 = vector.broadcast %cst_90 : f32 to vector<16x128xf32>
    %266 = arith.maximumf %264, %265 : vector<16x128xf32>
    %267 = arith.truncf %266 : vector<16x128xf32> to vector<16x128xbf16>
    %c7_91 = arith.constant 7 : index
    %c0_92 = arith.constant 0 : index
    %c0_93 = arith.constant 0 : index
    %268 = vector.load %arg6[%c7_91, %c0_92, %c0_93] : memref<8x128x128xbf16, #tpu.memory_space<vmem>>, vector<1x128x128xbf16>
    %269 = vector.shape_cast %268 : vector<1x128x128xbf16> to vector<128x128xbf16>
    %cst_94 = arith.constant dense<0.000000e+00> : vector<16x128xf32>
    %270 = tpu.matmul %267, %269, %cst_94 {dimension_numbers = #tpu.dot_dimension_numbers<[1], [0], [0], [1], [0, 0, 1, 1], [], []>} : vector<16x128xbf16>, vector<128x128xbf16>, vector<16x128xf32> -> vector<16x128xf32>
    %c10 = arith.constant 10 : index
    %c0_95 = arith.constant 0 : index
    %271 = vector.load %arg7[%c10, %c0_95] : memref<13x128xf32, #tpu.memory_space<vmem>>, vector<1x128xf32>
    %272 = vector.shape_cast %271 : vector<1x128xf32> to vector<128xf32>
    %273 = vector.shape_cast %272 : vector<128xf32> to vector<1x128xf32>
    %274 = vector.broadcast %273 : vector<1x128xf32> to vector<16x128xf32>
    %275 = arith.addf %270, %274 : vector<16x128xf32>
    %cst_96 = arith.constant 0.000000e+00 : f32
    %276 = vector.broadcast %cst_96 : f32 to vector<16x128xf32>
    %277 = arith.maximumf %275, %276 : vector<16x128xf32>
    %c11 = arith.constant 11 : index
    %c0_97 = arith.constant 0 : index
    %278 = vector.load %arg7[%c11, %c0_97] : memref<13x128xf32, #tpu.memory_space<vmem>>, vector<1x128xf32>
    %279 = vector.shape_cast %278 : vector<1x128xf32> to vector<128xf32>
    %280 = vector.shape_cast %279 : vector<128xf32> to vector<1x128xf32>
    %281 = vector.broadcast %280 : vector<1x128xf32> to vector<16x128xf32>
    %282 = arith.mulf %277, %281 : vector<16x128xf32>
    %c12 = arith.constant 12 : index
    %c0_98 = arith.constant 0 : index
    %283 = vector.load %arg7[%c12, %c0_98] : memref<13x128xf32, #tpu.memory_space<vmem>>, vector<1x128xf32>
    %284 = vector.shape_cast %283 : vector<1x128xf32> to vector<128xf32>
    %285 = vector.shape_cast %284 : vector<128xf32> to vector<1x128xf32>
    %286 = vector.broadcast %285 : vector<1x128xf32> to vector<16x128xf32>
    %287 = arith.addf %282, %286 : vector<16x128xf32>
    %cst_99 = arith.constant dense<0.000000e+00> : vector<16xf32>
    %288 = vector.multi_reduction <add>, %287, %cst_99 [1] : vector<16x128xf32> to vector<16xf32>
    %289 = vector.shape_cast %288 : vector<16xf32> to vector<16x1xf32>
    %290 = math.tanh %289 : vector<16x1xf32>
    %291 = vector.shape_cast %290 : vector<16x1xf32> to vector<1x1x16xf32>
    %c0_100 = arith.constant 0 : index
    %c0_101 = arith.constant 0 : index
    %c0_102 = arith.constant 0 : index
    %292 = vector.load %arg8[%c0_100, %c0_101, %c0_102] : memref<1x1x16xf32, #tpu.memory_space<vmem>>, vector<1x1x16xf32>
    tpu.vector_store %arg8[%c0_100, %c0_101, %c0_102], %291 {strides = array<i32>} : memref<1x1x16xf32, #tpu.memory_space<vmem>>, vector<1x1x16xf32>,
    return
  }
  func.func @transform_0(%arg0: i32) -> (i32, i32, i32) {
    %c0_i32 = arith.constant 0 : i32
    %c0_i32_0 = arith.constant 0 : i32
    %c0_i32_1 = arith.constant 0 : i32
    return %arg0, %c0_i32, %c0_i32_0 : i32, i32, i32
  }
  func.func @transform_1(%arg0: i32) -> (i32, i32, i32) {
    %c0_i32 = arith.constant 0 : i32
    %c0_i32_0 = arith.constant 0 : i32
    %c0_i32_1 = arith.constant 0 : i32
    return %arg0, %c0_i32, %c0_i32_0 : i32, i32, i32
  }
  func.func @transform_2(%arg0: i32) -> (i32, i32, i32) {
    %c0_i32 = arith.constant 0 : i32
    %c0_i32_0 = arith.constant 0 : i32
    %c0_i32_1 = arith.constant 0 : i32
    return %arg0, %c0_i32, %c0_i32_0 : i32, i32, i32
  }
  func.func @transform_3(%arg0: i32) -> (i32, i32) {
    %c0_i32 = arith.constant 0 : i32
    %c0_i32_0 = arith.constant 0 : i32
    return %arg0, %c0_i32 : i32, i32
  }
  func.func @transform_4(%arg0: i32) -> (i32, i32, i32) {
    %c0_i32 = arith.constant 0 : i32
    %c0_i32_0 = arith.constant 0 : i32
    %c0_i32_1 = arith.constant 0 : i32
    %c0_i32_2 = arith.constant 0 : i32
    return %c0_i32, %c0_i32_0, %c0_i32_1 : i32, i32, i32
  }
  func.func @transform_5(%arg0: i32) -> (i32, i32, i32) {
    %c0_i32 = arith.constant 0 : i32
    %c0_i32_0 = arith.constant 0 : i32
    %c0_i32_1 = arith.constant 0 : i32
    %c0_i32_2 = arith.constant 0 : i32
    return %c0_i32, %c0_i32_0, %c0_i32_1 : i32, i32, i32
  }
  func.func @transform_6(%arg0: i32) -> (i32, i32) {
    %c0_i32 = arith.constant 0 : i32
    %c0_i32_0 = arith.constant 0 : i32
    %c0_i32_1 = arith.constant 0 : i32
    return %c0_i32, %c0_i32_0 : i32, i32
  }
  func.func @transform_7(%arg0: i32) -> (i32, i32, i32) {
    %c0_i32 = arith.constant 0 : i32
    %c0_i32_0 = arith.constant 0 : i32
    %c0_i32_1 = arith.constant 0 : i32
    return %arg0, %c0_i32, %c0_i32_0 : i32, i32, i32
  }
}

</mosaic_0001>

<bundles_post_ra>
// kernel: tpu_custom_call.1
= control target key start
LH: loop header
LB: loop body
LE: loop exit
PB: predicated region body
PF: predicated region fallthrough
CT: control target
= control target key end

     0   :  { %12 = vsyncpa [#allocation3], 0  ;;  %s2447_s0 = inlined_call_operand.hbm [shape: f32[2,8,8], index: 0, kind: input, shape index: {}]   ;;  %s2448_s1 = inlined_call_operand.hbm [shape: f32[2,8,8], index: 1, kind: input, shape index: {}]   ;;  %s2449_s2 = inlined_call_operand.hbm [shape: f32[2,8,8], index: 2, kind: input, shape index: {}]   ;;  %s2450_s3 = inlined_call_operand.vmem [shape: f32[2,8], index: 3, kind: input, shape index: {}]   ;;  %s2451_s4 = inlined_call_operand.hbm [shape: bf16[3,8,128], index: 4, kind: input, shape index: {}]   ;;  %s2452_s5 = inlined_call_operand.hbm [shape: bf16[8,128,128], index: 5, kind: input, shape index: {}]   ;;  %s2453_s6 = inlined_call_operand.hbm [shape: f32[13,128], index: 6, kind: input, shape index: {}]   ;;  %s2454_s7 = inlined_call_operand.hbm [shape: f32[1,1,16], index: 7, kind: output, shape index: {}]  }
   0x1   :  { %13 = vsyncpa [#allocation6], 0 }
   0x2   :  { %14 = vsyncpa [#allocation9], 0 }
   0x3   :  { %15 = vsyncpa [#allocation12], 0 }
   0x4   :  { %16 = vsyncpa [#allocation4], 0  ;;  %s34_s26 = sshll.u32 %s2448_s1, 4  ;;  %s2123_s27 = smov [#allocation5]   ;;  %s35_s26 = int_to_ptr.hbm [resolvable:$true] %s34_s26 }
   0x5   :  { %s36_s28 = sshll.u32 %s2123_s27, 4  ;;  %s62_s8 = sshll.u32 %s2451_s4, 4  ;;  %s37_s28 = int_to_ptr.vmem [resolvable:$true] %s36_s28  ;;  %s63_s8 = int_to_ptr.hbm [resolvable:$true] %s62_s8 }
   0x6   :  { %s2124_s9 = smov 128   ;;  %s2125_s10 = smov 8  }
   0x7   :  { %42 = dma.hbm_to_vmem [thread:$0]  %s35_s26, 256, %s37_s28, [#allocation6], %s2124_s9, %s2124_s9, %s2125_s10  }
   0x8   :  { %s2126_s11 = smov [#allocation8]   ;;  %s2127_s13 = smov 64  }
   0x9   :  { %s64_s12 = sshll.u32 %s2126_s11, 4  ;;  %s2128_s1 = smov 4   ;;  %s65_s12 = int_to_ptr.vmem [resolvable:$true] %s64_s12 }
   0xa   :  { %70 = dma.hbm_to_vmem [thread:$0]  %s63_s8, 192, %s65_s12, [#allocation9], %s2127_s13, %s2127_s13, %s2128_s1  }
   0xb   :  { %s21_s16 = sshll.u32 %s2447_s0, 4  ;;  %s2129_s17 = smov [#allocation2]   ;;  %s22_s16 = int_to_ptr.hbm [resolvable:$true] %s21_s16 }
   0xc   :  { %s23_s4 = sshll.u32 %s2129_s17, 4  ;;  %s47_s20 = sshll.u32 %s2449_s2, 4  ;;  %s24_s4 = int_to_ptr.vmem [resolvable:$true] %s23_s4  ;;  %s48_s20 = int_to_ptr.hbm [resolvable:$true] %s47_s20 }
   0xd   :  { %29 = dma.hbm_to_vmem [thread:$0]  %s22_s16, 256, %s24_s4, [#allocation3], %s2124_s9, %s2124_s9, %s2125_s10  }
   0xe   :  { %s2130_s21 = smov [#allocation7]   ;;  %s75_s25 = sshll.u32 %s2452_s5, 4  ;;  %s76_s25 = int_to_ptr.hbm [resolvable:$true] %s75_s25 }
   0xf   :  { %s49_s22 = sshll.u32 %s2130_s21, 4  ;;  %s88_s2 = sshll.u32 %s2453_s6, 4  ;;  %s50_s22 = int_to_ptr.vmem [resolvable:$true] %s49_s22  ;;  %s89_s2 = int_to_ptr.hbm [resolvable:$true] %s88_s2 }
  0x10   :  { %55 = dma.hbm_to_vmem [thread:$0]  %s48_s20, 256, %s50_s22, [#allocation6], %s2124_s9, %s2124_s9, %s2125_s10  }
  0x11   :  { %s2131_s27 = smov [#allocation10]   ;;  %s2132_s29 = smov [#allocation11]  }
  0x12   :  { %s77_s28 = sshll.u32 %s2131_s27, 4  ;;  %s90_s30 = sshll.u32 %s2132_s29, 4  ;;  %s78_s28 = int_to_ptr.vmem [resolvable:$true] %s77_s28  ;;  %s91_s30 = int_to_ptr.vmem [resolvable:$true] %s90_s30 }
  0x13   :  { %83 = dma.hbm_to_vmem [thread:$0]  %s76_s25, 8192, %s78_s28, [#allocation9], %s2127_s13, %s2127_s13, %s2128_s1  }
  0x14   :  { %96 = dma.hbm_to_vmem [thread:$0]  %s89_s2, 256, %s91_s30, [#allocation12], %s2124_s9, %s2124_s9, %s2125_s10  }
  0x15   :  { %2113 = dma.done.wait [#allocation3], 256  }
  0x16   :  { %2114 = vsyncadd [#allocation3], 4294967040 }
  0x17   :  { %2115 = dma.done.wait [#allocation6], 512  }
  0x18   :  { %2116 = vsyncadd [#allocation6], 4294966784 }
  0x19   :  { %2117 = dma.done.wait [#allocation9], 8384  }
  0x1a   :  { %2118 = vsyncadd [#allocation9], 4294958912 }
  0x1b   :  { %2119 = dma.done.wait [#allocation12], 256  }
  0x1c   :  { %2120 = vsyncadd [#allocation12], 4294967040  ;;  %vm132_vm0 = vcmask 1043456   ;;  %v125_v0 = vld [vmem:[#allocation8] sm:$0xf]  ;;  %v122_v6 = vld [vmem:[#allocation2] sm:$0xff] }
  0x1d   :  { %v237_v1 = vld [vmem:[#allocation8 + $0x4] sm:$0xf]  ;;  %v348_v2 = vld [vmem:[#allocation8 + $0x8] sm:$0xf]  ;;  %v134_v3 = vsel %vm132_vm0, %v125_v0, 0  ;;  %v123_v7 = vld [vmem:[#allocation2 + $0x8] sm:$0xff] }
  0x1e   :  { %v244_v4 = vsel %vm132_vm0, %v237_v1, 0  ;;  %v355_v5 = vsel %vm132_vm0, %v348_v2, 0  ;;  %v233_v8 = vld [vmem:[#allocation5] sm:$0xff]  ;;  %143 = vmatpush.bf16.msra.mxu1 %v134_v3  ;;  %v124_v9 = vpack.c.bf16 %v123_v7, %v122_v6  ;;  %vm128_vm1 = vcmask 64512   ;;  %v234_v10 = vld [vmem:[#allocation5 + $0x8] sm:$0xff]  ;;  %v344_v11 = vld [vmem:[#allocation7] sm:$0xff] }
  0x1f   :  { %253 = vmatpush.bf16.msra.mxu2 %v244_v4  ;;  %v345_v12 = vld [vmem:[#allocation7 + $0x8] sm:$0xff]  ;;  %364 = vmatpush.bf16.msra.mxu0 %v355_v5  ;;  %v235_v13 = vpack.c.bf16 %v234_v10, %v233_v8  ;;  %v1825_v15 = vld [vmem:[#allocation10 + $0x38] sm:$0xff]  ;;  %v1822_v24 = vld [vmem:[#allocation10 + $0x20] sm:$0xff]  ;;  %s1530_s11 = sshll.u32 %s2454_s7, 4  ;;  %s1531_s11 = int_to_ptr.hbm [resolvable:$true] %s1530_s11 }
  0x20   :  { %v346_v14 = vpack.c.bf16 %v345_v12, %v344_v11  ;;  %v1841_v16 = vld [vmem:[#allocation10 + $0xb8] sm:$0xff]  ;;  %v1824_v18 = vld [vmem:[#allocation10 + $0x30] sm:$0xff]  ;;  %v1823_v21 = vld [vmem:[#allocation10 + $0x28] sm:$0xff] }
  0x21   :  { %v1833_v17 = vld [vmem:[#allocation10 + $0x78] sm:$0xff]  ;;  %1543 = vmatmul.msk.bf16.vlgmr.msra.gmra.mxu1 %vm128_vm1, %v124_v9  ;;  %v1840_v19 = vld [vmem:[#allocation10 + $0xb0] sm:$0xff]  ;;  %v1839_v22 = vld [vmem:[#allocation10 + $0xa8] sm:$0xff] }
  0x22   :  { %1576 = vmatmul.msk.bf16.vlgmr.msra.gmra.mxu2 %vm128_vm1, %v235_v13  ;;  %1609 = vmatmul.msk.bf16.vlgmr.msra.gmra.mxu0 %vm128_vm1, %v346_v14  ;;  %v1832_v20 = vld [vmem:[#allocation10 + $0x70] sm:$0xff]  ;;  %v1831_v23 = vld [vmem:[#allocation10 + $0x68] sm:$0xff]  ;;  %v1838_v25 = vld [vmem:[#allocation10 + $0xa0] sm:$0xff] }
  0x23   :  { %219 = vmatpush.bf16.msrb.mxu1 %v1825_v15  ;;  %441 = vmatpush.bf16.msrb.mxu2 %v1841_v16  ;;  %v1821_v26 = vld [vmem:[#allocation10 + $0x18] sm:$0xff]  ;;  %v1830_v27 = vld [vmem:[#allocation10 + $0x60] sm:$0xff]  ;;  %v1820_v29 = vld [vmem:[#allocation10 + $0x10] sm:$0xff] }
  0x24   :  { %330 = vmatpush.bf16.msra.mxu3 %v1833_v17  ;;  %v1837_v28 = vld [vmem:[#allocation10 + $0x98] sm:$0xff]  ;;  %v1836_v31 = vld [vmem:[#allocation10 + $0x90] sm:$0xff]  ;;  %v1819_v32 = vld [vmem:[#allocation10 + $0x8] sm:$0xff] }
  0x25   :  { %v1829_v30 = vld [vmem:[#allocation10 + $0x58] sm:$0xff]  ;;  %v1828_v33 = vld [vmem:[#allocation10 + $0x50] sm:$0xff]  ;;  %v1835_v34 = vld [vmem:[#allocation10 + $0x88] sm:$0xff] }
  0x26   :  { %v1818_v35 = vld [vmem:[#allocation10] sm:$0xff]  ;;  %v1827_v36 = vld [vmem:[#allocation10 + $0x48] sm:$0xff]  ;;  %v1857_v39 = vld [vmem:[#allocation10 + $0x138] sm:$0xff] }
  0x27   :  { %220 = vmatpush.bf16.msrb.mxu1 %v1824_v18  ;;  %442 = vmatpush.bf16.msrb.mxu2 %v1840_v19  ;;  %v1834_v37 = vld [vmem:[#allocation10 + $0x80] sm:$0xff]  ;;  %v1849_v40 = vld [vmem:[#allocation10 + $0xf8] sm:$0xff]  ;;  %v1856_v41 = vld [vmem:[#allocation10 + $0x130] sm:$0xff] }
  0x28   :  { %331 = vmatpush.bf16.msra.mxu3 %v1832_v20  ;;  %v1826_v38 = vld [vmem:[#allocation10 + $0x40] sm:$0xff]  ;;  %523 = vmatpush.bf16.msrb.mxu0 %v1849_v40  ;;  %v1848_v42 = vld [vmem:[#allocation10 + $0xf0] sm:$0xff]  ;;  %v1855_v43 = vld [vmem:[#allocation10 + $0x128] sm:$0xff]  ;;  %v2133_v40 = vmov 0.0  }
  0x29   :  { %v1854_v44 = vld [vmem:[#allocation10 + $0x120] sm:$0xff]  ;;  %v1847_v5 = vld [vmem:[#allocation10 + $0xe8] sm:$0xff]  ;;  %v1853_v6 = vld [vmem:[#allocation10 + $0x118] sm:$0xff] }
  0x2a   :  { %v1896_v46 = vld [vmem:[#allocation11] ss:$0 sm:$0xff]  ;;  %v1897_v48 = vld [vmem:[#allocation11 + $0x2] ss:$0 sm:$0xff]  ;;  %v1898_v54 = vld [vmem:[#allocation11 + $0x1] ss:$0 sm:$0xff] }
  0x2b   :  { %221 = vmatpush.bf16.msrb.mxu1 %v1823_v21  ;;  %443 = vmatpush.bf16.msrb.mxu2 %v1839_v22  ;;  %v1846_v7 = vld [vmem:[#allocation10 + $0xe0] sm:$0xff]  ;;  %v1852_v8 = vld [vmem:[#allocation10 + $0x110] sm:$0xff]  ;;  %v1845_v9 = vld [vmem:[#allocation10 + $0xd8] sm:$0xff] }
  0x2c   :  { %332 = vmatpush.bf16.msra.mxu3 %v1831_v23  ;;  %524 = vmatpush.bf16.msrb.mxu0 %v1848_v42  ;;  %v1851_v10 = vld [vmem:[#allocation10 + $0x108] sm:$0xff]  ;;  %v1844_v11 = vld [vmem:[#allocation10 + $0xd0] sm:$0xff]  ;;  %v1850_v12 = vld [vmem:[#allocation10 + $0x100] sm:$0xff] }
  0x2d   :  { %v1843_v13 = vld [vmem:[#allocation10 + $0xc8] sm:$0xff]  ;;  %v1842_v14 = vld [vmem:[#allocation10 + $0xc0] sm:$0xff] }
  0x2e   :  { %v1899_v15 = vld [vmem:[#allocation11 + $0x3] ss:$0 sm:$0xff]  ;;  %v1901_v16 = vld [vmem:[#allocation11 + $0x4] ss:$0 sm:$0xff] }
  0x2f   :  { %222 = vmatpush.bf16.msrb.mxu1 %v1822_v24  ;;  %444 = vmatpush.bf16.msrb.mxu2 %v1838_v25  ;;  %v1900_v24 = vld [vmem:[#allocation11 + $0x5] ss:$0 sm:$0xff] }
  0x30   :  { %333 = vmatpush.bf16.msra.mxu3 %v1830_v27  ;;  %525 = vmatpush.bf16.msrb.mxu0 %v1847_v5 }
  0x33   :  { %223 = vmatpush.bf16.msrb.mxu1 %v1821_v26  ;;  %445 = vmatpush.bf16.msrb.mxu2 %v1837_v28 }
  0x34   :  { %334 = vmatpush.bf16.msra.mxu3 %v1829_v30  ;;  %526 = vmatpush.bf16.msrb.mxu0 %v1846_v7 }
  0x37   :  { %224 = vmatpush.bf16.msrb.mxu1 %v1820_v29  ;;  %446 = vmatpush.bf16.msrb.mxu2 %v1836_v31 }
  0x38   :  { %335 = vmatpush.bf16.msra.mxu3 %v1828_v33  ;;  %527 = vmatpush.bf16.msrb.mxu0 %v1845_v9 }
  0x3b   :  { %225 = vmatpush.bf16.msrb.mxu1 %v1819_v32  ;;  %447 = vmatpush.bf16.msrb.mxu2 %v1835_v34  ;;  %v648_v34 = vlaneseq }
  0x3c   :  { %336 = vmatpush.bf16.msra.mxu3 %v1827_v36  ;;  %528 = vmatpush.bf16.msrb.mxu0 %v1844_v11  ;;  %v2213_v36 = vld [vmem:[#allocation11 + $0x7] ss:$0 sm:$0xff] }
  0x3f   :  { %226 = vmatpush.bf16.msrb.mxu1 %v1818_v35  ;;  %448 = vmatpush.bf16.msrb.mxu2 %v1834_v37  ;;  %v2211_v35 = vand.u32 127, %v648_v34 }
  0x40   :  { %337 = vmatpush.bf16.msra.mxu3 %v1826_v38  ;;  %529 = vmatpush.bf16.msrb.mxu0 %v1843_v13 }
  0x41   :  { %vm979_vm2 = vcmp.ge.s32.totalorder %v2211_v35, 96  ;;  %vm980_vm3 = vcmp.lt.s32.totalorder %v2211_v35, 112  ;;  %vm1117_vm5 = vcmp.ge.s32.totalorder %v2211_v35, 112  ;;  %vm973_vm6 = vcmp.ge.s32.totalorder %v2211_v35, 32 }
  0x42   :  { %vm981_vm4 = vmand %vm979_vm2, %vm980_vm3  ;;  %v2225_v42 = vsel %vm1117_vm5, 1.0, %v2133_v40  ;;  %vm974_vm7 = vcmp.lt.s32.totalorder %v2211_v35, 48  ;;  %vm1111_vm8 = vcmp.ge.s32.totalorder %v2211_v35, 48  ;;  %vm1112_vm9 = vcmp.lt.s32.totalorder %v2211_v35, 64 }
  0x43   :  { %607 = vmatpush.bf16.msra.mxu1 %v1857_v39  ;;  %vm975_vm10 = vmand %vm973_vm6, %vm974_vm7  ;;  %vm787_vm12 = vcmp.ge.s32.totalorder %v2211_v35, 80  ;;  %vm788_vm13 = vcmp.lt.s32.totalorder %v2211_v35, 96  ;;  %vm673_vm14 = vcmp.lt.s32.totalorder %v2211_v35, 16  ;;  %vm678_vm2 = vcmp.ge.s32.totalorder %v2211_v35, 64 }
  0x44   :  { %530 = vmatpush.bf16.msrb.mxu0 %v1842_v14  ;;  %vm1113_vm11 = vmand %vm1111_vm8, %vm1112_vm9  ;;  %vm679_vm3 = vcmp.lt.s32.totalorder %v2211_v35, 80  ;;  %vm782_vm5 = vcmp.lt.s32.totalorder %v2211_v35, 32  ;;  %vm645_vm8 = vcmask 130048   ;;  %vm737_vm9 = vcmask 195584  }
  0x45   :  { %vm789_vm15 = vmand %vm787_vm12, %vm788_vm13 }
  0x46   :  { %vm680_vm6 = vmand %vm678_vm2, %vm679_vm3 }
  0x47   :  { %608 = vmatpush.bf16.msra.mxu1 %v1856_v41  ;;  %v2222_v41 = vsel %vm981_vm4, 1.0, %v2133_v40  ;;  %vm781_vm4 = vcmp.ge.s32.totalorder %v2211_v35, 16 }
  0x48   :  { %vm783_vm7 = vmand %vm781_vm4, %vm782_vm5 }
  0x4b   :  { %609 = vmatpush.bf16.msra.mxu1 %v1855_v43 }
  0x4f   :  { %610 = vmatpush.bf16.msra.mxu1 %v1854_v44  ;;  %v1903_v44 = vld [vmem:[#allocation11 + $0x6] ss:$0 sm:$0xff] }
  0x53   :  { %611 = vmatpush.bf16.msra.mxu1 %v1853_v6 }
  0x57   :  { %612 = vmatpush.bf16.msra.mxu1 %v1852_v8 }
  0x5b   :  { %613 = vmatpush.bf16.msra.mxu1 %v1851_v10 }
  0x5f   :  { %614 = vmatpush.bf16.msra.mxu1 %v1850_v12 }
  0x9e   :  { %v145_v45 = vpop.f32.mrf.mxu1 }
  0x9f   :  { %v366_v47 = vpop.f32.mrf.mxu0  ;;  %v146_v49 = vadd.f32 %v1896_v46, %v145_v45 }
  0xa0   :  { %v367_v50 = vadd.f32 %v1897_v48, %v366_v47 }
  0xa1   :  { %v150_v53 = vmax.f32 %v146_v49, 0.0 }
  0xa2   :  { %v371_v57 = vmax.f32 %v367_v50, 0.0 }
  0xa5   :  { %v255_v51 = vpop.f32.mrf.mxu2 }
  0xa6   :  { %v147_v52 = vpop.f32.mrf.mxu1  ;;  %v256_v61 = vadd.f32 %v1898_v54, %v255_v51 }
  0xa7   :  { %v148_v55 = vadd.f32 %v1896_v46, %v147_v52  ;;  %v368_v56 = vpop.f32.mrf.mxu0 }
  0xa8   :  { %v369_v58 = vadd.f32 %v1897_v48, %v368_v56  ;;  %v260_v2 = vmax.f32 %v256_v61, 0.0  ;;  %v649_v56 = vshrl.u32 %v648_v34, 7 }
  0xa9   :  { %v151_v59 = vmax.f32 %v148_v55, 0.0 }
  0xaa   :  { %v372_v60 = vmax.f32 %v369_v58, 0.0  ;;  %1895 = vset.pattern.permute.xlu1 %v649_v56  ;;  %v2248_v58 = vld [vmem:[%s2450_s3] sm:$0x3]  ;;  %1894 = vset.pattern.permute.xlu0 %v649_v56  ;;  %s2134_s3 = smov [#allocation13]  }
  0xab   :  { %v152_v62 = vpack.c.bf16 %v151_v59, %v150_v53  ;;  %v1714_v53 = vsel %vm975_vm10, 1.0, %v2133_v40  ;;  %641 = vrot.lane.b32.xlu0 %v2248_v58, %s2125_s10  ;;  %v647_v6 = vperm.slane %v2248_v58, 0  ;;  %s1528_s8 = sshll.u32 %s2134_s3, 4  ;;  %s1529_s8 = int_to_ptr.vmem [resolvable:$true] %s1528_s8 }
  0xac   :  { %v373_v63 = vpack.c.bf16 %v372_v60, %v371_v57  ;;  %v1718_v57 = vsel %vm1113_vm11, 1.0, %v2133_v40 }
  0xad   :  { %v257_v0 = vpop.f32.mrf.mxu2  ;;  %227 = vmatmul.bf16.vlgmr.msrb.gmra.mxu1 %v152_v62 }
  0xae   :  { %v258_v1 = vadd.f32 %v1898_v54, %v257_v0  ;;  %449 = vmatmul.bf16.vlgmr.msrb.gmra.mxu2 %v373_v63 }
  0xb0   :  { %v261_v3 = vmax.f32 %v258_v1, 0.0 }
  0xb2   :  { %v262_v4 = vpack.c.bf16 %v261_v3, %v260_v2  ;;  %652 = vperm.xlu1 %1895, %v647_v6  }
  0xb4   :  { %338 = vmatmul.bf16.vlgmr.msra.gmra.mxu3 %v262_v4 }
 0x12a   :  { %v228_v17 = vpop.f32.mrf.mxu1 }
 0x12b   :  { %v229_v19 = vadd.f32 %v1899_v15, %v228_v17 }
 0x131   :  { %v450_v27 = vpop.f32.mrf.mxu2 }
 0x132   :  { %v230_v26 = vpop.f32.mrf.mxu1  ;;  %v451_v29 = vadd.f32 %v1900_v24, %v450_v27 }
 0x133   :  { %v231_v28 = vadd.f32 %v1899_v15, %v230_v26 }
 0x135   :  { %v538_v30 = vpack.c.bf16 %v231_v28, %v451_v29  ;;  %v2300_v28 = vsel %vm673_vm14, 1.0, %v2133_v40 }
 0x137   :  { %v339_v18 = vpop.f32.mrf.mxu3 }
 0x138   :  { %v340_v20 = vadd.f32 %v1901_v16, %v339_v18 }
 0x139   :  { %v452_v31 = vpop.f32.mrf.mxu2 }
 0x13a   :  { %v537_v21 = vpack.c.bf16 %v340_v20, %v229_v19  ;;  %v453_v32 = vadd.f32 %v1900_v24, %v452_v31 }
 0x13c   :  { %615 = vmatmul.bf16.vlgmr.msra.gmra.mxu1 %v537_v21 }
 0x13f   :  { %v341_v22 = vpop.f32.mrf.mxu3 }
 0x140   :  { %v342_v23 = vadd.f32 %v1901_v16, %v341_v22 }
 0x142   :  { %v455_v25 = vpack.c.bf16 %v342_v23, %v340_v20  ;;  %v539_v33 = vpack.c.bf16 %v453_v32, %v342_v23 }
 0x144   :  { %531 = vmatmul.bf16.vlgmr.msrb.gmra.mxu0 %v455_v25 }
 0x14c   :  { %620 = vmatmul.bf16.gmra.mxu1 %v538_v30  ;;  %v1709_v30 = vsel %vm789_vm15, 1.0, %v2133_v40 }
 0x15c   :  { %625 = vmatmul.bf16.gmra.mxu1 %v539_v33 }
 0x1b9   :  { %v616_v37 = vpop.f32.mrf.mxu1 }
 0x1ba   :  { %v617_v38 = vadd.f32 %v2213_v36, %v616_v37  ;;  %v2315_v37 = vsel %vm680_vm6, 1.0, %v2133_v40 }
 0x1bc   :  { %v2219_v39 = vpack.c.bf16 %v617_v38, %v617_v38 }
 0x1be   :  { %v2228_v43 = vunpack.c.l.bf16 %v2219_v39  ;;  %v694_v25 = vunpack.c.l.b16 %v2219_v39 }
 0x1c0   :  { %v1041_v45 = vmul.f32 %v2222_v41, %v2228_v43  ;;  %v1179_v46 = vmul.f32 %v2225_v42, %v2228_v43  ;;  %v849_v34 = vmul.f32 %v1709_v30, %v2228_v43 }
 0x1c1   :  { %v532_v47 = vpop.f32.mrf.mxu0  ;;  %v618_v48 = vpop.f32.mrf.mxu1 }
 0x1c2   :  { %v533_v49 = vadd.f32 %v1903_v44, %v532_v47  ;;  %v619_v50 = vadd.f32 %v2213_v36, %v618_v48  ;;  %v1047_v62 = vpack.c.bf16 %v1041_v45, %v1041_v45  ;;  %v1185_v15 = vpack.c.bf16 %v1179_v46, %v1179_v46 }
 0x1c3   :  { %v654_v45 = vperm.slane %v2248_v58, 1  ;;  %v855_v48 = vpack.c.bf16 %v849_v34, %v849_v34 }
 0x1c4   :  { %v631_v51 = vpack.c.bf16 %v533_v49, %v533_v49  ;;  %v634_v52 = vpack.c.bf16 %v619_v50, %v619_v50  ;;  %v2262_v7 = vunpack.c.l.b16 %v1047_v62  ;;  %v2290_v23 = vunpack.c.l.b16 %v1185_v15 }
 0x1c5   :  { %v2323_v49 = vmul.f32 %v2315_v37, %v2228_v43  ;;  %659 = vperm.xlu0 %1894, %v654_v45  }
 0x1c6   :  { %v2240_v54 = vunpack.c.l.bf16 %v631_v51  ;;  %v2242_v55 = vunpack.c.l.bf16 %v634_v52  ;;  %v695_v21 = vunpack.c.l.b16 %v634_v52 }
 0x1c8   :  { %v1042_v61 = vmul.f32 %v2222_v41, %v2242_v55  ;;  %v2255_v63 = vmul.f32 %v1714_v53, %v2240_v54  ;;  %v2258_v0 = vmul.f32 %v1718_v57, %v2240_v54  ;;  %v1180_v9 = vmul.f32 %v2225_v42, %v2242_v55 }
 0x1c9   :  { %v534_v59 = vpop.f32.mrf.mxu0  ;;  %v621_v60 = vpop.f32.mrf.mxu1  ;;  %v2297_v27 = vpack.c.b16 %v695_v21, %v694_v25  ;;  %v687_v32 = vmul.f32 %v2300_v28, %v2240_v54  ;;  %v850_v56 = vmul.f32 %v1709_v30, %v2242_v55  ;;  %v770_v43 = vmul.f32 %v2315_v37, %v2242_v55 }
 0x1ca   :  { %v535_v1 = vadd.f32 %v1903_v44, %v534_v59  ;;  %v622_v2 = vadd.f32 %v2213_v36, %v621_v60  ;;  %v1048_v3 = vpack.c.bf16 %v1042_v61, %v1042_v61  ;;  %v1186_v20 = vpack.c.bf16 %v1180_v9, %v1180_v9 }
 0x1cb   :  { %v689_v39 = vpack.c.bf16 %v687_v32, %v687_v32  ;;  %v2318_v44 = vsel %vm783_vm7, 1.0, %v2133_v40  ;;  %v2331_v59 = vunpack.c.l.b16 %v855_v48  ;;  %v776_v15 = vpack.c.bf16 %v770_v43, %v770_v43 }
 0x1cc   :  { %v632_v4 = vpack.c.bf16 %v535_v1, %v535_v1  ;;  %v635_v5 = vpack.c.bf16 %v622_v2, %v622_v2  ;;  %v2264_v8 = vunpack.c.l.b16 %v1048_v3  ;;  %v2292_v24 = vunpack.c.l.b16 %v1186_v20 }
 0x1cd   :  { %v794_v51 = vmul.f32 %v2318_v44, %v2240_v54 }
 0x1ce   :  { %v2268_v10 = vunpack.c.l.bf16 %v632_v4  ;;  %v696_v11 = vunpack.c.l.b16 %v635_v5  ;;  %v764_v12 = vunpack.c.l.bf16 %v635_v5  ;;  %v1059_v13 = vpack.c.b16 %v2264_v8, %v2262_v7 }
 0x1cf   :  { %v1197_v26 = vpack.c.b16 %v2292_v24, %v2290_v23  ;;  %v796_v61 = vpack.c.bf16 %v794_v51, %v794_v51  ;;  %v856_v4 = vpack.c.bf16 %v850_v56, %v850_v56 }
 0x1d0   :  { %v2272_v14 = vpack.c.b16 %v696_v11, %v696_v11  ;;  %v2275_v17 = vmul.f32 %v2222_v41, %v764_v12  ;;  %v2278_v18 = vmul.f32 %v1714_v53, %v2268_v10  ;;  %v2281_v19 = vmul.f32 %v1718_v57, %v2268_v10 }
 0x1d1   :  { %v623_v16 = vpop.f32.mrf.mxu1  ;;  %v2287_v22 = vmul.f32 %v2225_v42, %v764_v12  ;;  %v851_v52 = vmul.f32 %v1709_v30, %v764_v12  ;;  %v771_v40 = vmul.f32 %v2315_v37, %v764_v12  ;;  %v865_v34 = vunpack.c.l.b16 %v856_v4 }
 0x1d2   :  { %707 = vmatpush.bf16.xpose.msrb.mxu3 %v2272_v14  ;;  %v624_v33 = vadd.f32 %v2213_v36, %v623_v16  ;;  %v989_v8 = vpack.c.bf16 %v2278_v18, %v2278_v18 }
 0x1d3   :  { %v857_v62 = vpack.c.bf16 %v851_v52, %v851_v52  ;;  %v777_v1 = vpack.c.bf16 %v771_v40, %v771_v40 }
 0x1d4   :  { %v636_v46 = vpack.c.bf16 %v624_v33, %v624_v33 }
 0x1d5   :  { %v866_v25 = vunpack.c.l.b16 %v857_v62  ;;  %v922_v32 = vunpack.c.l.b16 %v777_v1 }
 0x1d6   :  { %v765_v58 = vunpack.c.l.bf16 %v636_v46 }
 0x1d7   :  { %v868_v56 = vpack.c.b16 %v866_v25, %v866_v25 }
 0x1d8   :  { %v852_v55 = vmul.f32 %v1709_v30, %v765_v58  ;;  %v1044_v12 = vmul.f32 %v2222_v41, %v765_v58 }
 0x1d9   :  { %v626_v29 = vpop.f32.mrf.mxu1 }
 0x1da   :  { %708 = vmatpush.bf16.xpose.msrb.mxu3 %v2297_v27  ;;  %v627_v31 = vadd.f32 %v2213_v36, %v626_v29 }
 0x1dc   :  { %v637_v38 = vpack.c.bf16 %v627_v31, %v627_v31 }
 0x1de   :  { %v766_v53 = vunpack.c.l.bf16 %v637_v38  ;;  %v718_v31 = vunpack.c.l.b16 %v637_v38 }
 0x1e0   :  { %v853_v2 = vmul.f32 %v1709_v30, %v766_v53  ;;  %v1045_v3 = vmul.f32 %v2222_v41, %v766_v53  ;;  %v1183_v51 = vmul.f32 %v2225_v42, %v766_v53 }
 0x1e1   :  { %v628_v47 = vpop.f32.mrf.mxu1  ;;  %709 = vmatmul.bf16.vlgmr.msrb.gmra.mxu3 %v689_v39  ;;  %v717_v39 = vunpack.c.l.b16 %v636_v46 }
 0x1e2   :  { %804 = vmatpush.bf16.xpose.msra.mxu3 %v2272_v14  ;;  %v629_v50 = vadd.f32 %v2213_v36, %v628_v47  ;;  %v775_v36 = vpack.c.bf16 %v2323_v49, %v2323_v49  ;;  %v1051_v33 = vpack.c.bf16 %v1045_v3, %v1045_v3  ;;  %v859_v47 = vpack.c.bf16 %v853_v2, %v853_v2 }
 0x1e3   :  { %v2347_v43 = vpack.c.b16 %v718_v31, %v717_v39  ;;  %v773_v2 = vmul.f32 %v2315_v37, %v766_v53 }
 0x1e4   :  { %v638_v57 = vpack.c.bf16 %v629_v50, %v629_v50  ;;  %v1085_v38 = vunpack.c.l.b16 %v1051_v33  ;;  %v893_v1 = vunpack.c.l.b16 %v859_v47  ;;  %v920_v25 = vunpack.c.l.b16 %v775_v36 }
 0x1e6   :  { %v719_v60 = vunpack.c.l.b16 %v638_v57  ;;  %v767_v54 = vunpack.c.l.bf16 %v638_v57  ;;  %v858_v57 = vpack.c.bf16 %v852_v55, %v852_v55 }
 0x1e8   :  { %v2338_v5 = vpack.c.b16 %v719_v60, %v719_v60  ;;  %v854_v6 = vmul.f32 %v1709_v30, %v767_v54  ;;  %v1046_v9 = vmul.f32 %v2222_v41, %v767_v54  ;;  %v1184_v11 = vmul.f32 %v2225_v42, %v767_v54 }
 0x1e9   :  { %v774_v16 = vmul.f32 %v2315_v37, %v767_v54  ;;  %v1050_v41 = vpack.c.bf16 %v1044_v12, %v1044_v12  ;;  %v924_v60 = vpack.c.b16 %v922_v32, %v922_v32  ;;  %v1182_v54 = vmul.f32 %v2225_v42, %v765_v58 }
 0x1ea   :  { %805 = vmatpush.bf16.xpose.msra.mxu3 %v2297_v27  ;;  %730 = vmatpush.bf16.xpose.msra.mxu2 %v2338_v5  ;;  %v860_v20 = vpack.c.bf16 %v854_v6, %v854_v6  ;;  %v1052_v21 = vpack.c.bf16 %v1046_v9, %v1046_v9  ;;  %v1190_v29 = vpack.c.bf16 %v1184_v11, %v1184_v11  ;;  %v874_v11 = vsel %vm132_vm0, %v868_v56, 0 }
 0x1eb   :  { %817 = vmatpush.bf16.xpose.msra.mxu0 %v2338_v5  ;;  %v780_v50 = vpack.c.bf16 %v774_v16, %v774_v16  ;;  %v1084_v3 = vunpack.c.l.b16 %v1050_v41  ;;  %v1189_v9 = vpack.c.bf16 %v1183_v51, %v1183_v51  ;;  %v892_v55 = vunpack.c.l.b16 %v858_v57  ;;  %v653_v51 = vpop.permute.xlu1 %652 }
 0x1ec   :  { %v894_v45 = vunpack.c.l.b16 %v860_v20  ;;  %v1086_v30 = vunpack.c.l.b16 %v1052_v21  ;;  %v1224_v48 = vunpack.c.l.b16 %v1190_v29  ;;  %v921_v42 = vunpack.c.l.b16 %v776_v15 }
 0x1ed   :  { %v950_v6 = vunpack.c.l.b16 %v780_v50  ;;  %v772_v12 = vmul.f32 %v2315_v37, %v765_v58  ;;  %v688_v16 = vmul.f32 %v2300_v28, %v2268_v10  ;;  %v930_v53 = vsel %vm132_vm0, %v924_v60, 0 }
 0x1ee   :  { %v896_v52 = vpack.c.b16 %v894_v45, %v894_v45  ;;  %v1088_v40 = vpack.c.b16 %v1086_v30, %v1086_v30  ;;  %v1226_v4 = vpack.c.b16 %v1224_v48, %v1224_v48  ;;  %v1188_v20 = vpack.c.bf16 %v1182_v54, %v1182_v54  ;;  %v642_v30 = vpop.permute.xlu0 %641 }
 0x1ef   :  { %v895_v21 = vpack.c.b16 %v893_v1, %v892_v55  ;;  %v795_v15 = vmul.f32 %v2318_v44, %v2268_v10  ;;  %v779_v37 = vpack.c.bf16 %v773_v2, %v773_v2  ;;  %v867_v58 = vpack.c.b16 %v865_v34, %v2331_v59 }
 0x1f0   :  { %v902_v46 = vsel %vm132_vm0, %v896_v52, 0  ;;  %v1094_v62 = vsel %vm132_vm0, %v1088_v40, 0  ;;  %v1232_v28 = vsel %vm132_vm0, %v1226_v4, 0  ;;  %v952_v29 = vpack.c.b16 %v950_v6, %v950_v6 }
 0x1f1   :  { %806 = vmatmul.bf16.vlgmr.msra.gmra.mxu3 %v796_v61  ;;  %1102 = vmatpush.bf16.msrb.mxu1 %v1094_v62  ;;  %v1087_v61 = vpack.c.b16 %v1085_v38, %v1084_v3  ;;  %v1223_v31 = vunpack.c.l.b16 %v1189_v9  ;;  %v923_v32 = vpack.c.b16 %v921_v42, %v920_v25  ;;  %v778_v33 = vpack.c.bf16 %v772_v12, %v772_v12 }
 0x1f2   :  { %910 = vmatpush.bf16.msrb.mxu3 %v902_v46  ;;  %731 = vmatpush.bf16.xpose.msra.mxu2 %v2347_v43  ;;  %v690_v39 = vpack.c.bf16 %v688_v16, %v688_v16  ;;  %v1222_v49 = vunpack.c.l.b16 %v1188_v20  ;;  %v797_v36 = vpack.c.bf16 %v795_v15, %v795_v15  ;;  %v949_v10 = vunpack.c.l.b16 %v779_v37 }
 0x1f3   :  { %818 = vmatpush.bf16.xpose.msra.mxu0 %v2347_v43  ;;  %v958_v44 = vsel %vm132_vm0, %v952_v29, 0  ;;  %v948_v59 = vunpack.c.l.b16 %v778_v33  ;;  %v644_v47 = vsel %vm128_vm1, 0.0, %v642_v30  ;;  %vm1521_vm1 = vcmask 122880  }
 0x1f4   :  { %v1225_v45 = vpack.c.b16 %v1223_v31, %v1222_v49  ;;  %v646_v41 = vsel %vm645_vm8, %v644_v47, 0.0 }
 0x1f5   :  { %1103 = vmatpush.bf16.msrb.mxu1 %v1087_v61  ;;  %v951_v34 = vpack.c.b16 %v949_v10, %v948_v59  ;;  %v661_v48 = vmul.f32 -1e+09, %v646_v41 }
 0x1f6   :  { %911 = vmatpush.bf16.msrb.mxu3 %v895_v21 }
 0x1f7   :  { %v664_v50 = vperm.slane %v661_v48, 0  ;;  %v663_v38 = vrot.slane %v661_v48, 1 }
 0x1f9   :  { %1240 = vmatpush.bf16.msra.mxu1 %v1232_v28  ;;  %732 = vmatmul.bf16.vlgmr.msra.gmra.mxu2 %v690_v39  ;;  %v2373_v52 = vmul.f32 %v664_v50, %v653_v51  ;;  %v665_v54 = vperm.slane %v663_v38, 0 }
 0x1fa   :  { %882 = vmatpush.bf16.msrb.mxu2 %v874_v11  ;;  %996 = vmatpush.bf16.xpose.msra.mxu3 %v2272_v14 }
 0x1fb   :  { %938 = vmatpush.bf16.msrb.mxu0 %v930_v53 }
 0x1fc   :  { %819 = vmatmul.bf16.vlgmr.msra.gmra.mxu0 %v797_v36 }
 0x1fd   :  { %1241 = vmatpush.bf16.msra.mxu1 %v1225_v45 }
 0x1fe   :  { %883 = vmatpush.bf16.msrb.mxu2 %v867_v58 }
 0x1ff   :  { %939 = vmatpush.bf16.msrb.mxu0 %v923_v32 }
 0x202   :  { %966 = vmatpush.bf16.msra.mxu2 %v958_v44  ;;  %997 = vmatpush.bf16.xpose.msra.mxu3 %v2297_v27  ;;  %v1049_v44 = vpack.c.bf16 %v2275_v17, %v2275_v17 }
 0x203   :  { %1009 = vmatpush.bf16.xpose.msra.mxu0 %v2338_v5 }
 0x204   :  { %v1058_v59 = vunpack.c.l.b16 %v1049_v44 }
 0x206   :  { %967 = vmatpush.bf16.msra.mxu2 %v951_v34  ;;  %v1060_v47 = vpack.c.b16 %v1058_v59, %v1058_v59 }
 0x20b   :  { %1010 = vmatpush.bf16.xpose.msra.mxu0 %v2347_v43 }
 0x237   :  { %v660_v46 = vpop.permute.xlu0 %659 }
 0x238   :  { %v2377_v62 = vmul.f32 %v665_v54, %v660_v46 }
 0x264   :  { %v710_v40 = vpop.f32.mrf.mxu3 }
 0x265   :  { %v711_v56 = vadd.f32 %v710_v40, %v2373_v52  ;;  %v1066_v40 = vsel %vm132_vm0, %v1060_v47, 0 }
 0x267   :  { %v738_v57 = vsel %vm737_vm9, %v711_v56, -inf }
 0x268   :  { %739 = vmax.xlane.f32.xlu2 %v738_v57 }
 0x26c   :  { %v712_v60 = vpop.f32.mrf.mxu3 }
 0x274   :  { %v807_v1 = vpop.f32.mrf.mxu3 }
 0x275   :  { %v808_v2 = vadd.f32 %v807_v1, %v2373_v52 }
 0x277   :  { %v824_v4 = vsel %vm737_vm9, %v808_v2, -inf }
 0x278   :  { %825 = vmax.xlane.f32.xlu0 %v824_v4 }
 0x279   :  { %v820_v3 = vpop.f32.mrf.mxu0 }
 0x27a   :  { %v821_v6 = vadd.f32 %v820_v3, %v2377_v62 }
 0x27c   :  { %v827_v9 = vsel %vm737_vm9, %v821_v6, -inf  ;;  %v733_v11 = vpop.f32.mrf.mxu2  ;;  %v809_v55 = vpop.f32.mrf.mxu3 }
 0x27d   :  { %828 = vmax.xlane.f32.xlu1 %v827_v9  ;;  %v734_v49 = vadd.f32 %v733_v11, %v2377_v62 }
 0x27f   :  { %v741_v36 = vsel %vm737_vm9, %v734_v49, -inf }
 0x281   :  { %v822_v42 = vpop.f32.mrf.mxu0 }
 0x284   :  { %v735_v12 = vpop.f32.mrf.mxu2 }
 0x2db   :  { %v740_v61 = vpop.xlane.xlu2 %739 }
 0x2dc   :  { %v744_v15 = vsub.f32 %v711_v56, %v740_v61 }
 0x2de   :  { %v746_v28 = vmul.f32 1.442695, %v744_v15 }
 0x2eb   :  { %v826_v16 = vpop.xlane.xlu0 %825 }
 0x2ec   :  { %v830_v53 = vsub.f32 %v808_v2, %v826_v16 }
 0x2ee   :  { %v832_v20 = vmul.f32 1.442695, %v830_v53 }
 0x2f0   :  { %v829_v21 = vpop.xlane.xlu1 %828  ;;  %1909 = vpow2.f32 %v832_v20 }
 0x2f1   :  { %v831_v25 = vsub.f32 %v821_v6, %v829_v21 }
 0x2f3   :  { %v834_v37 = vmul.f32 1.442695, %v831_v25 }
 0x2f5   :  { %1911 = vpow2.f32 %v834_v37 }
 0x2f6   :  { %v1910_v58 = vpop.eup %1909  ;;  %1913 = vpow2.f32 %v746_v28 }
 0x2f7   :  { %v836_v29 = vsel %vm737_vm9, %v1910_v58, 0.0 }
 0x2f8   :  { %837 = vadd.xlane.f32.xlu1 %v836_v29 }
 0x2fb   :  { %v1912_v31 = vpop.eup %1911 }
 0x2fc   :  { %v839_v32 = vsel %vm737_vm9, %v1912_v31, 0.0  ;;  %v1914_v33 = vpop.eup %1913 }
 0x2fd   :  { %840 = vadd.xlane.f32.xlu2 %v839_v32  ;;  %v750_v39 = vsel %vm737_vm9, %v1914_v33, 0.0 }
 0x305   :  { %751 = vadd.xlane.f32.xlu2 %v750_v39 }
 0x30d   :  { %742 = vmax.xlane.f32.xlu2 %v741_v36 }
 0x36b   :  { %v838_v10 = vpop.xlane.xlu1 %837 }
 0x36c   :  { %1915 = vrcp.f32 %v838_v10 }
 0x370   :  { %v841_v45 = vpop.xlane.xlu2 %840 }
 0x371   :  { %1917 = vrcp.f32 %v841_v45 }
 0x372   :  { %v1916_v34 = vpop.eup %1915 }
 0x373   :  { %v844_v30 = vmul.f32 %v1916_v34, %v1910_v58 }
 0x375   :  { %v846_v48 = vpack.c.bf16 %v844_v30, %v844_v30 }
 0x377   :  { %v1918_v41 = vpop.eup %1917  ;;  %1710 = vmatmul.msk.bf16.vlgmr.msrb.gmra.mxu2 %vm737_vm9, %v846_v48 }
 0x378   :  { %v845_v50 = vmul.f32 %v1918_v41, %v1912_v31  ;;  %v752_v51 = vpop.xlane.xlu2 %751  ;;  %1074 = vmatpush.bf16.msrb.mxu2 %v1066_v40 }
 0x379   :  { %1919 = vrcp.f32 %v752_v51 }
 0x37a   :  { %v847_v56 = vpack.c.bf16 %v845_v50, %v845_v50 }
 0x37c   :  { %1711 = vmatmul.msk.bf16.vlgmr.msrb.gmra.mxu3 %vm737_vm9, %v847_v56  ;;  %1075 = vmatpush.bf16.msrb.mxu2 %v1059_v13  ;;  %v1126_v13 = vpack.c.bf16 %v2258_v0, %v2258_v0 }
 0x37d   :  { %1134 = vmatpush.bf16.xpose.msrb.mxu3 %v2272_v14  ;;  %v988_v14 = vpack.c.bf16 %v2255_v63, %v2255_v63 }
 0x37f   :  { %v1920_v17 = vpop.eup %1919 }
 0x380   :  { %v758_v57 = vmul.f32 %v1920_v17, %v1914_v33  ;;  %v743_v60 = vpop.xlane.xlu2 %742 }
 0x381   :  { %v745_v38 = vsub.f32 %v734_v49, %v743_v60 }
 0x382   :  { %v760_v54 = vpack.c.bf16 %v758_v57, %v758_v57 }
 0x383   :  { %v748_v46 = vmul.f32 1.442695, %v745_v38  ;;  %v1865_v38 = vld [vmem:[#allocation10 + $0x178] sm:$0xff] }
 0x384   :  { %1712 = vmatmul.msk.bf16.vlgmr.msrb.gmra.mxu0 %vm737_vm9, %v760_v54  ;;  %v1864_v54 = vld [vmem:[#allocation10 + $0x170] sm:$0xff] }
 0x385   :  { %1921 = vpow2.f32 %v748_v46  ;;  %1135 = vmatpush.bf16.xpose.msrb.mxu3 %v2297_v27  ;;  %1147 = vmatpush.bf16.xpose.msrb.mxu0 %v2338_v5  ;;  %v1127_v27 = vpack.c.bf16 %v2281_v19, %v2281_v19 }
 0x38b   :  { %v1922_v1 = vpop.eup %1921 }
 0x38c   :  { %998 = vmatmul.bf16.vlgmr.msra.gmra.mxu3 %v988_v14  ;;  %v753_v7 = vsel %vm737_vm9, %v1922_v1, 0.0 }
 0x38d   :  { %1148 = vmatpush.bf16.xpose.msrb.mxu0 %v2347_v43  ;;  %754 = vadd.xlane.f32.xlu1 %v753_v7  ;;  %v1187_v43 = vpack.c.bf16 %v2287_v22, %v2287_v22 }
 0x38e   :  { %1317 = vmatpush.bf16.msra.mxu3 %v1865_v38 }
 0x38f   :  { %v1196_v6 = vunpack.c.l.b16 %v1187_v43 }
 0x391   :  { %v1198_v55 = vpack.c.b16 %v1196_v6, %v1196_v6 }
 0x392   :  { %1318 = vmatpush.bf16.msra.mxu3 %v1864_v54 }
 0x393   :  { %v1204_v12 = vsel %vm132_vm0, %v1198_v55, 0  ;;  %v1862_v55 = vld [vmem:[#allocation10 + $0x160] sm:$0xff]  ;;  %vm1518_vm0 = vcmask 130112  }
 0x394   :  { %1011 = vmatmul.bf16.vlgmr.msra.gmra.mxu0 %v989_v8 }
 0x39c   :  { %1136 = vmatmul.bf16.vlgmr.msrb.gmra.mxu3 %v1126_v13 }
 0x3a4   :  { %1149 = vmatmul.bf16.vlgmr.msrb.gmra.mxu0 %v1127_v27 }
 0x3fa   :  { %v885_v63 = vpop.f32.mrf.mxu2 }
 0x3ff   :  { %v2410_v5 = vpop.f32.mrf.mxu3 }
 0x400   :  { %v755_v2 = vpop.xlane.xlu1 %754 }
 0x401   :  { %1923 = vrcp.f32 %v755_v2  ;;  %v941_v3 = vpop.f32.mrf.mxu0 }
 0x402   :  { %v2414_v4 = vadd.f32 %v941_v3, %v885_v63  ;;  %v887_v18 = vpop.f32.mrf.mxu2 }
 0x407   :  { %v1924_v9 = vpop.eup %1923  ;;  %v915_v0 = vpop.f32.mrf.mxu3 }
 0x408   :  { %v759_v11 = vmul.f32 %v1924_v9, %v1922_v1 }
 0x409   :  { %v943_v42 = vpop.f32.mrf.mxu0 }
 0x40a   :  { %v761_v19 = vpack.c.bf16 %v759_v11, %v759_v11  ;;  %v1863_v11 = vld [vmem:[#allocation10 + $0x168] sm:$0xff]  ;;  %v1861_v42 = vld [vmem:[#allocation10 + $0x158] sm:$0xff] }
 0x40b   :  { %1319 = vmatpush.bf16.msra.mxu3 %v1863_v11 }
 0x40c   :  { %1713 = vmatmul.msk.bf16.vlgmr.msra.gmra.mxu2 %vm737_vm9, %v761_v19  ;;  %v1860_v19 = vld [vmem:[#allocation10 + $0x150] sm:$0xff] }
 0x40d   :  { %1212 = vmatpush.bf16.msra.mxu2 %v1204_v12  ;;  %v1859_v12 = vld [vmem:[#allocation10 + $0x148] sm:$0xff] }
 0x40f   :  { %v999_v16 = vpop.f32.mrf.mxu3  ;;  %1320 = vmatpush.bf16.msra.mxu3 %v1862_v55 }
 0x410   :  { %v1000_v22 = vadd.f32 %v999_v16, %v2373_v52  ;;  %v1858_v16 = vld [vmem:[#allocation10 + $0x140] sm:$0xff] }
 0x411   :  { %1213 = vmatpush.bf16.msra.mxu2 %v1197_v26  ;;  %v1012_v53 = vpop.f32.mrf.mxu0 }
 0x412   :  { %v1016_v61 = vsel %vm737_vm9, %v1000_v22, -inf  ;;  %v1013_v20 = vadd.f32 %v1012_v53, %v2377_v62  ;;  %v1872_v53 = vld [vmem:[#allocation10 + $0x1b0] sm:$0xff] }
 0x413   :  { %1017 = vmax.xlane.f32.xlu2 %v1016_v61  ;;  %1321 = vmatpush.bf16.msra.mxu3 %v1861_v42  ;;  %v1516_v42 = vadd.s32 4294967288, %v2211_v35 }
 0x414   :  { %v1019_v15 = vsel %vm737_vm9, %v1013_v20, -inf }
 0x417   :  { %v1001_v21 = vpop.f32.mrf.mxu3  ;;  %1322 = vmatpush.bf16.msra.mxu3 %v1860_v19 }
 0x419   :  { %v1014_v25 = vpop.f32.mrf.mxu0 }
 0x41a   :  { %v1870_v25 = vld [vmem:[#allocation10 + $0x1a0] sm:$0xff] }
 0x41b   :  { %1020 = vmax.xlane.f32.xlu2 %v1019_v15  ;;  %1323 = vmatpush.bf16.msra.mxu3 %v1859_v12 }
 0x41f   :  { %v1137_v37 = vpop.f32.mrf.mxu3  ;;  %1324 = vmatpush.bf16.msra.mxu3 %v1858_v16 }
 0x420   :  { %v1138_v28 = vadd.f32 %v1137_v37, %v2373_v52  ;;  %v1869_v37 = vld [vmem:[#allocation10 + $0x198] sm:$0xff] }
 0x421   :  { %v1150_v58 = vpop.f32.mrf.mxu0 }
 0x422   :  { %v1154_v29 = vsel %vm737_vm9, %v1138_v28, -inf  ;;  %v1151_v23 = vadd.f32 %v1150_v58, %v2377_v62 }
 0x423   :  { %1155 = vmax.xlane.f32.xlu2 %v1154_v29 }
 0x424   :  { %v1157_v31 = vsel %vm737_vm9, %v1151_v23, -inf }
 0x427   :  { %v1139_v24 = vpop.f32.mrf.mxu3 }
 0x429   :  { %v1152_v26 = vpop.f32.mrf.mxu0 }
 0x42b   :  { %1158 = vmax.xlane.f32.xlu2 %v1157_v31 }
 0x486   :  { %v1018_v32 = vpop.xlane.xlu2 %1017 }
 0x487   :  { %v1022_v33 = vsub.f32 %v1000_v22, %v1018_v32  ;;  %v1873_v22 = vld [vmem:[#allocation10 + $0x1b8] sm:$0xff] }
 0x488   :  { %1399 = vmatpush.bf16.msra.mxu0 %v1873_v22 }
 0x489   :  { %v1024_v39 = vmul.f32 1.442695, %v1022_v33 }
 0x48b   :  { %1925 = vpow2.f32 %v1024_v39 }
 0x48c   :  { %1400 = vmatpush.bf16.msra.mxu0 %v1872_v53 }
 0x48e   :  { %v1021_v49 = vpop.xlane.xlu2 %1020 }
 0x48f   :  { %v1023_v36 = vsub.f32 %v1013_v20, %v1021_v49  ;;  %v2429_v10 = vpop.f32.mrf.mxu2  ;;  %v1871_v20 = vld [vmem:[#allocation10 + $0x1a8] sm:$0xff] }
 0x490   :  { %1401 = vmatpush.bf16.msra.mxu0 %v1871_v20  ;;  %v970_v58 = vadd.f32 %v2429_v10, %v2410_v5  ;;  %v1880_v5 = vld [vmem:[#allocation10 + $0x1f0] sm:$0xff]  ;;  %v1879_v10 = vld [vmem:[#allocation10 + $0x1e8] sm:$0xff] }
 0x491   :  { %v1926_v52 = vpop.eup %1925  ;;  %v1026_v44 = vmul.f32 1.442695, %v1023_v36  ;;  %v1868_v36 = vld [vmem:[#allocation10 + $0x190] sm:$0xff] }
 0x492   :  { %v1028_v45 = vsel %vm737_vm9, %v1926_v52, 0.0 }
 0x493   :  { %1927 = vpow2.f32 %v1026_v44  ;;  %1029 = vadd.xlane.f32.xlu2 %v1028_v45  ;;  %v1866_v44 = vld [vmem:[#allocation10 + $0x180] sm:$0xff]  ;;  %v1881_v45 = vld [vmem:[#allocation10 + $0x1f8] sm:$0xff] }
 0x494   :  { %1402 = vmatpush.bf16.msra.mxu0 %v1870_v25 }
 0x496   :  { %v1156_v62 = vpop.xlane.xlu2 %1155 }
 0x497   :  { %v1160_v59 = vsub.f32 %v1138_v28, %v1156_v62  ;;  %v971_v34 = vpop.f32.mrf.mxu2 }
 0x498   :  { %1403 = vmatpush.bf16.msra.mxu0 %v1869_v37 }
 0x499   :  { %v1928_v30 = vpop.eup %1927  ;;  %v1162_v47 = vmul.f32 1.442695, %v1160_v59  ;;  %v1904_v59 = vld [vmem:[#allocation11 + $0x8] ss:$0 sm:$0xff] }
 0x49a   :  { %v1031_v41 = vsel %vm737_vm9, %v1928_v30, 0.0 }
 0x49b   :  { %1929 = vpow2.f32 %v1162_v47  ;;  %1032 = vadd.xlane.f32.xlu0 %v1031_v41 }
 0x49c   :  { %1404 = vmatpush.bf16.msra.mxu0 %v1868_v36 }
 0x49e   :  { %v1159_v48 = vpop.xlane.xlu2 %1158 }
 0x49f   :  { %v1161_v50 = vsub.f32 %v1151_v23, %v1159_v48  ;;  %v1877_v48 = vld [vmem:[#allocation10 + $0x1d8] sm:$0xff] }
 0x4a1   :  { %v1930_v51 = vpop.eup %1929  ;;  %v1164_v40 = vmul.f32 1.442695, %v1161_v50  ;;  %v1876_v50 = vld [vmem:[#allocation10 + $0x1d0] sm:$0xff] }
 0x4a2   :  { %v1166_v56 = vsel %vm737_vm9, %v1930_v51, 0.0 }
 0x4a3   :  { %1931 = vpow2.f32 %v1164_v40  ;;  %1167 = vadd.xlane.f32.xlu1 %v1166_v56  ;;  %v1874_v40 = vld [vmem:[#allocation10 + $0x1c0] sm:$0xff] }
 0x4a9   :  { %v1932_v17 = vpop.eup %1931 }
 0x4aa   :  { %v1169_v57 = vsel %vm737_vm9, %v1932_v17, 0.0 }
 0x4ab   :  { %1170 = vadd.xlane.f32.xlu2 %v1169_v57 }
 0x506   :  { %v1030_v60 = vpop.xlane.xlu2 %1029 }
 0x507   :  { %1933 = vrcp.f32 %v1030_v60 }
 0x50d   :  { %v1934_v46 = vpop.eup %1933 }
 0x50e   :  { %v1036_v14 = vmul.f32 %v1934_v46, %v1926_v52  ;;  %v1033_v1 = vpop.xlane.xlu0 %1032  ;;  %v1867_v52 = vld [vmem:[#allocation10 + $0x188] sm:$0xff] }
 0x50f   :  { %1935 = vrcp.f32 %v1033_v1  ;;  %1405 = vmatpush.bf16.msra.mxu0 %v1867_v52  ;;  %v1906_v1 = vld [vmem:[#allocation11 + $0xa] ss:$0 sm:$0xff] }
 0x510   :  { %v1038_v7 = vpack.c.bf16 %v1036_v14, %v1036_v14 }
 0x512   :  { %1716 = vmatmul.msk.bf16.vlgmr.msrb.gmra.mxu2 %vm737_vm9, %v1038_v7 }
 0x513   :  { %1406 = vmatpush.bf16.msra.mxu0 %v1866_v44  ;;  %1483 = vmatpush.bf16.msrb.mxu2 %v1881_v45 }
 0x515   :  { %v1936_v8 = vpop.eup %1935 }
 0x516   :  { %v1037_v13 = vmul.f32 %v1936_v8, %v1928_v30  ;;  %v1168_v27 = vpop.xlane.xlu1 %1167 }
 0x517   :  { %1937 = vrcp.f32 %v1168_v27  ;;  %1484 = vmatpush.bf16.msrb.mxu2 %v1880_v5 }
 0x518   :  { %v1039_v63 = vpack.c.bf16 %v1037_v13, %v1037_v13  ;;  %v1907_v13 = vld [vmem:[#allocation11 + $0xb] ss:$0 sm:$0xff] }
 0x51a   :  { %1717 = vmatmul.msk.bf16.vlgmr.msrb.gmra.mxu1 %vm737_vm9, %v1039_v63  ;;  %v1908_v63 = vld [vmem:[#allocation11 + $0xc] ss:$0 sm:$0xff] }
 0x51b   :  { %1485 = vmatpush.bf16.msrb.mxu2 %v1879_v10 }
 0x51d   :  { %v1938_v2 = vpop.eup %1937 }
 0x51e   :  { %v1174_v43 = vmul.f32 %v1938_v2, %v1930_v51  ;;  %v1171_v3 = vpop.xlane.xlu2 %1170  ;;  %v1875_v51 = vld [vmem:[#allocation10 + $0x1c8] sm:$0xff] }
 0x51f   :  { %1939 = vrcp.f32 %v1171_v3 }
 0x520   :  { %v1176_v18 = vpack.c.bf16 %v1174_v43, %v1174_v43 }
 0x522   :  { %1720 = vmatmul.msk.bf16.vlgmr.msra.gmra.mxu2 %vm737_vm9, %v1176_v18 }
 0x525   :  { %v1940_v6 = vpop.eup %1939 }
 0x526   :  { %v1175_v9 = vmul.f32 %v1940_v6, %v1932_v17  ;;  %v1905_v17 = vld [vmem:[#allocation11 + $0x9] ss:$0 sm:$0xff] }
 0x528   :  { %v1177_v0 = vpack.c.bf16 %v1175_v9, %v1175_v9 }
 0x52a   :  { %1721 = vmatmul.msk.bf16.vlgmr.msra.gmra.mxu1 %vm737_vm9, %v1177_v0 }
 0x595   :  { %v1077_v61 = vpop.f32.mrf.mxu2 }
 0x596   :  { %v1109_v23 = vadd.f32 %v1077_v61, %v2414_v4  ;;  %v1878_v4 = vld [vmem:[#allocation10 + $0x1e0] sm:$0xff] }
 0x597   :  { %v1105_v21 = vpop.f32.mrf.mxu1  ;;  %1486 = vmatpush.bf16.msrb.mxu2 %v1878_v4 }
 0x598   :  { %v1110_v24 = vadd.f32 %v1105_v21, %v970_v58 }
 0x59b   :  { %1487 = vmatpush.bf16.msrb.mxu2 %v1877_v48 }
 0x59d   :  { %v1079_v15 = vpop.f32.mrf.mxu2 }
 0x59f   :  { %v1107_v28 = vpop.f32.mrf.mxu1  ;;  %1488 = vmatpush.bf16.msrb.mxu2 %v1876_v50 }
 0x5a3   :  { %1489 = vmatpush.bf16.msrb.mxu2 %v1875_v51 }
 0x5a5   :  { %v1215_v29 = vpop.f32.mrf.mxu2 }
 0x5a6   :  { %v1247_v31 = vadd.f32 %v1215_v29, %v1109_v23 }
 0x5a7   :  { %v1243_v26 = vpop.f32.mrf.mxu1  ;;  %1490 = vmatpush.bf16.msrb.mxu2 %v1874_v40 }
 0x5a8   :  { %v1248_v32 = vadd.f32 %v1243_v26, %v1110_v24 }
 0x5aa   :  { %v1249_v33 = vpack.c.bf16 %v1248_v32, %v1247_v31 }
 0x5ac   :  { %1325 = vmatmul.bf16.vlgmr.msra.gmra.mxu3 %v1249_v33 }
 0x5ad   :  { %v1217_v39 = vpop.f32.mrf.mxu2 }
 0x5af   :  { %v1245_v49 = vpop.f32.mrf.mxu1 }
 0x62f   :  { %v1326_v62 = vpop.f32.mrf.mxu3 }
 0x630   :  { %v1327_v30 = vadd.f32 %v1904_v59, %v1326_v62 }
 0x637   :  { %v1328_v34 = vpop.f32.mrf.mxu3 }
 0x638   :  { %v1329_v47 = vadd.f32 %v1904_v59, %v1328_v34 }
 0x63a   :  { %v1331_v41 = vpack.c.bf16 %v1329_v47, %v1327_v30 }
 0x63c   :  { %1407 = vmatmul.bf16.vlgmr.msra.gmra.mxu0 %v1331_v41 }
 0x6b9   :  { %v1408_v56 = vpop.f32.mrf.mxu0 }
 0x6ba   :  { %v1409_v57 = vadd.f32 %v1905_v17, %v1408_v56 }
 0x6bc   :  { %v1413_v54 = vmax.f32 %v1409_v57, 0.0 }
 0x6c1   :  { %v1410_v60 = vpop.f32.mrf.mxu0 }
 0x6c2   :  { %v1411_v38 = vadd.f32 %v1905_v17, %v1410_v60 }
 0x6c4   :  { %v1414_v46 = vmax.f32 %v1411_v38, 0.0 }
 0x6c6   :  { %v1415_v14 = vpack.c.bf16 %v1414_v46, %v1413_v54 }
 0x6c8   :  { %1491 = vmatmul.bf16.vlgmr.msrb.gmra.mxu2 %v1415_v14 }
 0x74b   :  { %v1492_v7 = vpop.f32.mrf.mxu2 }
 0x74c   :  { %v1493_v8 = vadd.f32 %v1906_v1, %v1492_v7 }
 0x74e   :  { %v1497_v27 = vmax.f32 %v1493_v8, 0.0 }
 0x750   :  { %v1501_v2 = vmul.f32 %v1907_v13, %v1497_v27 }
 0x752   :  { %v1505_v43 = vadd.f32 %v1908_v63, %v1501_v2 }
 0x753   :  { %v1494_v3 = vpop.f32.mrf.mxu2 }
 0x754   :  { %v1495_v18 = vadd.f32 %v1906_v1, %v1494_v3  ;;  %1507 = vadd.xlane.f32.xlu0 %v1505_v43 }
 0x756   :  { %v1498_v6 = vmax.f32 %v1495_v18, 0.0 }
 0x758   :  { %v1502_v9 = vmul.f32 %v1907_v13, %v1498_v6 }
 0x75a   :  { %v1506_v0 = vadd.f32 %v1908_v63, %v1502_v9 }
 0x75c   :  { %1509 = vadd.xlane.f32.xlu1 %v1506_v0 }
 0x7c7   :  { %v1508_v11 = vpop.xlane.xlu0 %1507 }
 0x7c8   :  { %1941 = vtanh.f32 %v1508_v11 }
 0x7ce   :  { %v1942_v19 = vpop.eup %1941 }
 0x7cf   :  { %v1510_v55 = vpop.xlane.xlu1 %1509  ;;  %v1515_v16 = vperm.slane %v1942_v19, %v2211_v35 }
 0x7d0   :  { %1943 = vtanh.f32 %v1510_v55 }
 0x7d6   :  { %v1944_v12 = vpop.eup %1943 }
 0x7d7   :  { %v1517_v22 = vperm.slane %v1944_v12, %v1516_v42 }
 0x7d9   :  { %v1519_v53 = vsel %vm1518_vm0, %v1517_v22, %v1515_v16 }
 0x7da   :  { %1522 = vst.msk [vmem:[#allocation13] sm:$0x1] %vm1521_vm1, %v1519_v53 }
 0x7db   :  { %1533 = dma.vmem_to_hbm [thread:$0]  %s1529_s8, 16, %s1531_s11, [#allocation4]  }
 0x7dc   :  { %2121 = dma.done.wait [#allocation4], 16  }
 0x7dd   :  { %2122 = vsyncadd [#allocation4], 4294967280 }
 0x7de   :  { %1538 = vsyncpa [#allocation3], 1 }
 0x7df   :  { %1539 = vsyncpa [#allocation6], 1 }
 0x7e0   :  { %1540 = vsyncpa [#allocation9], 1 }
 0x7e1   :  { %1541 = vsyncpa [#allocation12], 1 }
 0x7e2   :  { %1542 = vsyncpa [#allocation4], 1 }

</bundles_post_ra>
